<compile_context>
chip_gen: v7x
topology: tpu7x:2x2x1
jax: 0.10.0
libtpu: 0.0.40
codegen_flags: <defaults>
</compile_context>

<pallas_src>
import jax
import jax.numpy as jnp
from jax import lax
from jax.experimental import pallas as pl
from jax.experimental.pallas import tpu as pltpu


# ----------------------------------------------------------------------------- kernel
def encoder_kernel(gi_ref, mask_ref, whh_ref, bhh_ref, wfc_ref, bfc_ref,
                   out_ref, hid_ref):
    # gi_ref:   [T, Bt, 6H] f32   precomputed input projections, columns [r_f|r_b|z_f|z_b|n_f|n_b]
    #                             (bwd direction already time-reversed)
    # mask_ref: [T, Bt, 2H] f32   cols[:H]=fwd valid at t=s, cols[H:]=bwd valid at t=T-1-s
    # whh_ref:  [2H, 6H] bf16     block-diagonal fused recurrent weights
    # bhh_ref:  [1, 6H]  f32
    # wfc_ref:  [2H, D]  bf16
    # bfc_ref:  [1, D]   f32
    # out_ref:  [T, Bt, 2H] f32   fwd half / bwd half
    # hid_ref:  [Bt, D]  f32
    T, Bt, H6 = gi_ref.shape
    H2 = out_ref.shape[2]
    H = H2 // 2
    H4 = 2 * H2

    whh = whh_ref[...]                                        # resident [2H, 6H] bf16
    bhh = jnp.broadcast_to(bhh_ref[...], (Bt, H6))            # hoisted bias broadcast

    h0 = jnp.zeros((Bt, H2), jnp.float32)                     # [h_f | h_b]

    def step(s, h):
        gi = gi_ref[s]                                        # [Bt, 6H]
        m = mask_ref[s]                                       # [Bt, 2H]
        # Single fused recurrent matmul for both directions (bf16 operands, f32 accumulate).
        gh = jnp.dot(h.astype(jnp.bfloat16), whh,
                     preferred_element_type=jnp.float32) + bhh
        # Gate math (PyTorch GRU): r, z, n; slices are multiples of 2H -> lane aligned.
        rz = jax.nn.sigmoid(gi[:, :H4] + gh[:, :H4])
        r = rz[:, :H2]
        z = rz[:, H2:]
        n = jnp.tanh(gi[:, H4:] + r * gh[:, H4:])
        h_new = (1.0 - z) * n + z * h
        h_out = m * h_new                                     # zero at padded positions
        out_ref[s, :, :H] = h_out[:, :H]                      # fwd output at time s
        out_ref[T - 1 - s, :, H:] = h_out[:, H:]              # bwd output at time T-1-s
        return h + m * (h_new - h)                            # freeze state on invalid steps

    h_fin = lax.fori_loop(0, T, step, h0, unroll=True)

    # hidden = tanh(fc(concat(h_fwd_final, h_bwd_final)))  -- h_fin is already the concat.
    hid_ref[...] = jnp.tanh(
        jnp.dot(h_fin.astype(jnp.bfloat16), wfc_ref[...],
                preferred_element_type=jnp.float32) + bfc_ref[...])


# ----------------------------------------------------------------------------- wrapper
def _fuse_recurrent_params(params):
    """Build block-diagonal fused W_hh / b_hh with gate-pair column layout [g_f | g_b]."""
    H = params["whh_f_t"].shape[0]
    Wf = params["whh_f_t"].reshape(H, 3, H)                   # [H, gate, H]
    Wb = params["whh_b_t"].reshape(H, 3, H)
    Z = jnp.zeros((H, 3, H), jnp.float32)
    top = jnp.concatenate([Wf, Z], axis=2).reshape(H, 6 * H)  # rows driven by h_f
    bot = jnp.concatenate([Z, Wb], axis=2).reshape(H, 6 * H)  # rows driven by h_b
    whh_cat = jnp.concatenate([top, bot], axis=0).astype(jnp.bfloat16)       # [2H, 6H]
    bhh_cat = jnp.concatenate(
        [params["bhh_f"].reshape(3, H), params["bhh_b"].reshape(3, H)],
        axis=1).reshape(1, 6 * H)                                            # [1, 6H]
    return whh_cat, bhh_cat


def encoder_forward(src, src_len, params, *, batch_block=8):
    """src: [T, B] int32 token ids; src_len: [B] int32 valid lengths (max == T)."""
    emb = jnp.take(params["embedding"], src, axis=0).astype(jnp.float32)     # [T, B, E]
    T, B, E = emb.shape
    H = params["whh_f_t"].shape[0]
    D = params["wfc_t"].shape[1]
    H2, H6 = 2 * H, 6 * H

    # ---- hoisted input projection for both directions: ONE [T*B, E] x [E, 6H] matmul ----
    wih_cat = jnp.concatenate([params["wih_f_t"], params["wih_b_t"]], axis=1)  # [E, 6H]
    bih_cat = jnp.concatenate([params["bih_f"], params["bih_b"]], axis=1)      # [1, 6H]
    gi = jnp.dot(emb.reshape(T * B, E), wih_cat,
                 precision=jax.lax.Precision.HIGHEST) + bih_cat
    gi = gi.reshape(T, B, H6)
    gi_f = gi[:, :, :3 * H].reshape(T, B, 3, H)
    gi_b = gi[:, :, 3 * H:][::-1].reshape(T, B, 3, H)          # bwd direction, time-reversed
    gi_cat = jnp.concatenate([gi_f, gi_b], axis=3).reshape(T, B, H6)  # [r_f|r_b|z_f|z_b|n_f|n_b]

    # ---- lane-dense validity masks (pack_padded semantics) ----
    t_idx = jnp.arange(T)
    m_f = (t_idx[:, None] < src_len[None, :]).astype(jnp.float32)              # [T, B]
    m_b = ((T - 1 - t_idx)[:, None] < src_len[None, :]).astype(jnp.float32)    # [T, B]
    mask_cat = jnp.concatenate(
        [jnp.broadcast_to(m_f[:, :, None], (T, B, H)),
         jnp.broadcast_to(m_b[:, :, None], (T, B, H))], axis=2)                # [T, B, 2H]

    whh_cat, bhh_cat = _fuse_recurrent_params(params)
    wfc_bf = params["wfc_t"].astype(jnp.bfloat16)                              # [2H, D]
    bfc = params["bfc"]                                                        # [1, D]

    bb = min(batch_block, B)
    assert B % bb == 0, "batch must be divisible by the batch block"
    grid = (B // bb,)

    outputs, hidden = pl.pallas_call(
        encoder_kernel,
        out_shape=(jax.ShapeDtypeStruct((T, B, H2), jnp.float32),
                   jax.ShapeDtypeStruct((B, D), jnp.float32)),
        grid_spec=pltpu.PrefetchScalarGridSpec(
            num_scalar_prefetch=0,
            grid=grid,
            in_specs=[
                pl.BlockSpec((T, bb, H6), lambda b: (0, b, 0)),   # gi (batch-tiled)
                pl.BlockSpec((T, bb, H2), lambda b: (0, b, 0)),   # mask (batch-tiled)
                pl.BlockSpec((H2, H6),    lambda b: (0, 0)),      # whh (resident)
                pl.BlockSpec((1, H6),     lambda b: (0, 0)),      # bhh
                pl.BlockSpec((H2, D),     lambda b: (0, 0)),      # wfc
                pl.BlockSpec((1, D),      lambda b: (0, 0)),      # bfc
            ],
            out_specs=(
                pl.BlockSpec((T, bb, H2), lambda b: (0, b, 0)),   # combined [T,B,2H] output
                pl.BlockSpec((bb, D),     lambda b: (b, 0)),      # hidden
            ),
        ),
        compiler_params=pltpu.CompilerParams(
            dimension_semantics=("parallel",)),                   # batch tiles -> cores
    )(gi_cat, mask_cat, whh_cat, bhh_cat, wfc_bf, bfc)

    return outputs, hidden


# ----------------------------------------------------------------------------- reference
def encoder_ref(src, src_len, params):
    """Pure-JAX reference mirroring the kernel math (bf16 MXU operands, f32 accumulate)."""
    emb = jnp.take(params["embedding"], src, axis=0).astype(jnp.float32)
    T, B, E = emb.shape
    H = params["whh_f_t"].shape[0]

    def run_dir(wih_t, whh_t, bih, bhh, reverse):
        gi_all = jnp.einsum("tbe,eh->tbh", emb, wih_t,
                            precision=jax.lax.Precision.HIGHEST) + bih
        whh_bf = whh_t.astype(jnp.bfloat16)

        def step(h, t):
            gi = gi_all[t]
            gh = jnp.dot(h.astype(jnp.bfloat16), whh_bf,
                         preferred_element_type=jnp.float32) + bhh
            r = jax.nn.sigmoid(gi[:, :H] + gh[:, :H])
            z = jax.nn.sigmoid(gi[:, H:2 * H] + gh[:, H:2 * H])
            n = jnp.tanh(gi[:, 2 * H:] + r * gh[:, 2 * H:])
            h_new = (1.0 - z) * n + z * h
            m = (src_len > t)[:, None].astype(jnp.float32)
            out = m * h_new
            h = h + m * (h_new - h)
            return h, out

        ts = jnp.arange(T)
        if reverse:
            ts = ts[::-1]
        h_last, outs = lax.scan(step, jnp.zeros((B, H), jnp.float32), ts)
        if reverse:
            outs = outs[::-1]
        return outs, h_last

    out_f, h_f = run_dir(params["wih_f_t"], params["whh_f_t"],
                         params["bih_f"], params["bhh_f"], False)
    out_b, h_b = run_dir(params["wih_b_t"], params["whh_b_t"],
                         params["bih_b"], params["bhh_b"], True)
    outputs = jnp.concatenate([out_f, out_b], axis=-1)
    h_cat = jnp.concatenate([h_f, h_b], axis=1)
    hidden = jnp.tanh(
        jnp.dot(h_cat.astype(jnp.bfloat16), params["wfc_t"].astype(jnp.bfloat16),
                preferred_element_type=jnp.float32) + params["bfc"])
    return outputs, hidden


# ----------------------------------------------------------------------------- demo
if __name__ == "__main__":
    key = jax.random.PRNGKey(0)
    V, E, H, D = 100, 64, 64, 64          # input_dim, emb_dim, enc_hid_dim, dec_hid_dim
    T, B = 10, 16                         # seq len, batch (2 batch tiles of 8)
    keys = jax.random.split(key, 13)
    s = 1.0 / float(jnp.sqrt(H))

    def u(k, shape):
        return jax.random.uniform(k, shape, jnp.float32, -s, s)

    # Weights stored pre-transposed for (x @ W^T) matmuls; gate column order [r | z | n].
    params = {
        "embedding": jax.random.normal(keys[0], (V, E), jnp.float32),
        "wih_f_t": u(keys[1], (E, 3 * H)),
        "whh_f_t": u(keys[2], (H, 3 * H)),
        "bih_f":   u(keys[3], (1, 3 * H)),
        "bhh_f":   u(keys[4], (1, 3 * H)),
        "wih_b_t": u(keys[5], (E, 3 * H)),
        "whh_b_t": u(keys[6], (H, 3 * H)),
        "bih_b":   u(keys[7], (1, 3 * H)),
        "bhh_b":   u(keys[8], (1, 3 * H)),
        "wfc_t":   u(keys[9], (2 * H, D)),
        "bfc":     u(keys[10], (1, D)),
    }

    src = jax.random.randint(keys[11], (T, B), 0, V, jnp.int32)
    src_len = jnp.array([10, 7, 10, 3, 5, 10, 1, 8, 9, 10, 4, 6, 2, 10, 7, 5], jnp.int32)

    outputs, hidden = jax.jit(encoder_forward)(src, src_len, params)
    jax.block_until_ready((outputs, hidden))

    ref_out, ref_hid = encoder_ref(src, src_len, params)
    assert outputs.shape == (T, B, 2 * H) and hidden.shape == (B, D)
    assert jnp.allclose(outputs, ref_out, atol=5e-3, rtol=5e-3), "outputs mismatch vs reference"
    assert jnp.allclose(hidden, ref_hid, atol=5e-3, rtol=5e-3), "hidden mismatch vs reference"

    print("KERNEL_OK")
</pallas_src>

<mosaic_0001>
module attributes {stable_mosaic.version = 11 : i64} {
  func.func @encoder_kernel(%arg0: i32, %arg1: memref<10x8x384xf32, #tpu.memory_space<vmem>>, %arg2: memref<10x8x128xf32, #tpu.memory_space<vmem>>, %arg3: memref<128x384xbf16, #tpu.memory_space<vmem>>, %arg4: memref<1x384xf32, #tpu.memory_space<vmem>>, %arg5: memref<128x64xbf16, #tpu.memory_space<vmem>>, %arg6: memref<1x64xf32, #tpu.memory_space<vmem>>, %arg7: memref<10x8x128xf32, #tpu.memory_space<vmem>>, %arg8: memref<8x64xf32, #tpu.memory_space<vmem>>) attributes {dimension_semantics = [#tpu.dimension_semantics<parallel>], iteration_bounds = array<i64: 2>, scalar_prefetch = 0 : i64, scratch_operands = 0 : i64, tpu.core_type = #tpu.core_type<tc>, window_params = [{transform_indices = @transform_0, window_bounds = array<i64: 10, 8, 384>}, {transform_indices = @transform_1, window_bounds = array<i64: 10, 8, 128>}, {pipeline_mode = #tpu.pipeline_mode<synchronous>, transform_indices = @transform_2, window_bounds = array<i64: 128, 384>}, {pipeline_mode = #tpu.pipeline_mode<synchronous>, transform_indices = @transform_3, window_bounds = array<i64: 1, 384>}, {pipeline_mode = #tpu.pipeline_mode<synchronous>, transform_indices = @transform_4, window_bounds = array<i64: 128, 64>}, {pipeline_mode = #tpu.pipeline_mode<synchronous>, transform_indices = @transform_5, window_bounds = array<i64: 1, 64>}, {transform_indices = @transform_6, window_bounds = array<i64: 10, 8, 128>}, {transform_indices = @transform_7, window_bounds = array<i64: 8, 64>}]} {
    %c0 = arith.constant 0 : index
    %c0_0 = arith.constant 0 : index
    %0 = vector.load %arg3[%c0, %c0_0] : memref<128x384xbf16, #tpu.memory_space<vmem>>, vector<128x384xbf16>
    %c0_1 = arith.constant 0 : index
    %c0_2 = arith.constant 0 : index
    %1 = vector.load %arg4[%c0_1, %c0_2] : memref<1x384xf32, #tpu.memory_space<vmem>>, vector<1x384xf32>
    %2 = vector.shape_cast %1 : vector<1x384xf32> to vector<1x384xf32>
    %3 = vector.broadcast %2 : vector<1x384xf32> to vector<8x384xf32>
    %cst = arith.constant 0.000000e+00 : f32
    %4 = vector.broadcast %cst : f32 to vector<8x128xf32>
    %c0_i32 = arith.constant 0 : i32
    %5 = arith.index_cast %c0_i32 : i32 to index
    %c0_3 = arith.constant 0 : index
    %c0_4 = arith.constant 0 : index
    %6 = vector.load %arg1[%5, %c0_3, %c0_4] : memref<10x8x384xf32, #tpu.memory_space<vmem>>, vector<1x8x384xf32>
    %7 = vector.shape_cast %6 : vector<1x8x384xf32> to vector<8x384xf32>
    %8 = arith.index_cast %c0_i32 : i32 to index
    %c0_5 = arith.constant 0 : index
    %c0_6 = arith.constant 0 : index
    %9 = vector.load %arg2[%8, %c0_5, %c0_6] : memref<10x8x128xf32, #tpu.memory_space<vmem>>, vector<1x8x128xf32>
    %10 = vector.shape_cast %9 : vector<1x8x128xf32> to vector<8x128xf32>
    %11 = arith.truncf %4 : vector<8x128xf32> to vector<8x128xbf16>
    %cst_7 = arith.constant dense<0.000000e+00> : vector<8x384xf32>
    %12 = tpu.matmul %11, %0, %cst_7 {dimension_numbers = #tpu.dot_dimension_numbers<[1], [0], [0], [1], [0, 0, 1, 1], [], []>} : vector<8x128xbf16>, vector<128x384xbf16>, vector<8x384xf32> -> vector<8x384xf32>
    %13 = arith.addf %12, %3 : vector<8x384xf32>
    %14 = vector.extract_strided_slice %7 {offsets = [0, 0], sizes = [8, 256], strides = [1, 1]} : vector<8x384xf32> to vector<8x256xf32>
    %15 = vector.extract_strided_slice %13 {offsets = [0, 0], sizes = [8, 256], strides = [1, 1]} : vector<8x384xf32> to vector<8x256xf32>
    %16 = arith.addf %14, %15 : vector<8x256xf32>
    %17 = arith.negf %16 : vector<8x256xf32>
    %18 = math.exp %17 : vector<8x256xf32>
    %cst_8 = arith.constant 1.000000e+00 : f32
    %19 = vector.broadcast %cst_8 : f32 to vector<8x256xf32>
    %20 = arith.addf %19, %18 : vector<8x256xf32>
    %21 = arith.divf %19, %20 : vector<8x256xf32>
    %22 = vector.extract_strided_slice %21 {offsets = [0, 0], sizes = [8, 128], strides = [1, 1]} : vector<8x256xf32> to vector<8x128xf32>
    %23 = vector.extract_strided_slice %21 {offsets = [0, 128], sizes = [8, 128], strides = [1, 1]} : vector<8x256xf32> to vector<8x128xf32>
    %24 = vector.extract_strided_slice %7 {offsets = [0, 256], sizes = [8, 128], strides = [1, 1]} : vector<8x384xf32> to vector<8x128xf32>
    %25 = vector.extract_strided_slice %13 {offsets = [0, 256], sizes = [8, 128], strides = [1, 1]} : vector<8x384xf32> to vector<8x128xf32>
    %26 = arith.mulf %22, %25 : vector<8x128xf32>
    %27 = arith.addf %24, %26 : vector<8x128xf32>
    %28 = math.tanh %27 : vector<8x128xf32>
    %cst_9 = arith.constant 1.000000e+00 : f32
    %29 = vector.broadcast %cst_9 : f32 to vector<8x128xf32>
    %30 = arith.subf %29, %23 : vector<8x128xf32>
    %31 = arith.mulf %30, %28 : vector<8x128xf32>
    %32 = arith.mulf %23, %4 : vector<8x128xf32>
    %33 = arith.addf %31, %32 : vector<8x128xf32>
    %34 = arith.mulf %10, %33 : vector<8x128xf32>
    %35 = vector.extract_strided_slice %34 {offsets = [0, 0], sizes = [8, 64], strides = [1, 1]} : vector<8x128xf32> to vector<8x64xf32>
    %36 = arith.index_cast %c0_i32 : i32 to index
    %c0_10 = arith.constant 0 : index
    %c0_11 = arith.constant 0 : index
    %37 = vector.load %arg7[%36, %c0_10, %c0_11] : memref<10x8x128xf32, #tpu.memory_space<vmem>>, vector<1x8x64xf32>
    %38 = vector.shape_cast %37 : vector<1x8x64xf32> to vector<8x64xf32>
    %39 = vector.shape_cast %35 : vector<8x64xf32> to vector<1x8x64xf32>
    tpu.vector_store %arg7[%36, %c0_10, %c0_11], %39 {strides = array<i32>} : memref<10x8x128xf32, #tpu.memory_space<vmem>>, vector<1x8x64xf32>,
    %40 = vector.extract_strided_slice %34 {offsets = [0, 64], sizes = [8, 64], strides = [1, 1]} : vector<8x128xf32> to vector<8x64xf32>
    %c9_i32 = arith.constant 9 : i32
    %41 = arith.subi %c9_i32, %c0_i32 : i32
    %42 = arith.index_cast %41 : i32 to index
    %c0_12 = arith.constant 0 : index
    %c64 = arith.constant 64 : index
    %43 = vector.load %arg7[%42, %c0_12, %c64] : memref<10x8x128xf32, #tpu.memory_space<vmem>>, vector<1x8x64xf32>
    %44 = vector.shape_cast %43 : vector<1x8x64xf32> to vector<8x64xf32>
    %45 = vector.shape_cast %40 : vector<8x64xf32> to vector<1x8x64xf32>
    tpu.vector_store %arg7[%42, %c0_12, %c64], %45 {strides = array<i32>} : memref<10x8x128xf32, #tpu.memory_space<vmem>>, vector<1x8x64xf32>,
    %46 = arith.subf %33, %4 : vector<8x128xf32>
    %47 = arith.mulf %10, %46 : vector<8x128xf32>
    %48 = arith.addf %4, %47 : vector<8x128xf32>
    %c1_i32 = arith.constant 1 : i32
    %49 = arith.index_cast %c1_i32 : i32 to index
    %c0_13 = arith.constant 0 : index
    %c0_14 = arith.constant 0 : index
    %50 = vector.load %arg1[%49, %c0_13, %c0_14] : memref<10x8x384xf32, #tpu.memory_space<vmem>>, vector<1x8x384xf32>
    %51 = vector.shape_cast %50 : vector<1x8x384xf32> to vector<8x384xf32>
    %52 = arith.index_cast %c1_i32 : i32 to index
    %c0_15 = arith.constant 0 : index
    %c0_16 = arith.constant 0 : index
    %53 = vector.load %arg2[%52, %c0_15, %c0_16] : memref<10x8x128xf32, #tpu.memory_space<vmem>>, vector<1x8x128xf32>
    %54 = vector.shape_cast %53 : vector<1x8x128xf32> to vector<8x128xf32>
    %55 = arith.truncf %48 : vector<8x128xf32> to vector<8x128xbf16>
    %cst_17 = arith.constant dense<0.000000e+00> : vector<8x384xf32>
    %56 = tpu.matmul %55, %0, %cst_17 {dimension_numbers = #tpu.dot_dimension_numbers<[1], [0], [0], [1], [0, 0, 1, 1], [], []>} : vector<8x128xbf16>, vector<128x384xbf16>, vector<8x384xf32> -> vector<8x384xf32>
    %57 = arith.addf %56, %3 : vector<8x384xf32>
    %58 = vector.extract_strided_slice %51 {offsets = [0, 0], sizes = [8, 256], strides = [1, 1]} : vector<8x384xf32> to vector<8x256xf32>
    %59 = vector.extract_strided_slice %57 {offsets = [0, 0], sizes = [8, 256], strides = [1, 1]} : vector<8x384xf32> to vector<8x256xf32>
    %60 = arith.addf %58, %59 : vector<8x256xf32>
    %61 = arith.negf %60 : vector<8x256xf32>
    %62 = math.exp %61 : vector<8x256xf32>
    %cst_18 = arith.constant 1.000000e+00 : f32
    %63 = vector.broadcast %cst_18 : f32 to vector<8x256xf32>
    %64 = arith.addf %63, %62 : vector<8x256xf32>
    %65 = arith.divf %63, %64 : vector<8x256xf32>
    %66 = vector.extract_strided_slice %65 {offsets = [0, 0], sizes = [8, 128], strides = [1, 1]} : vector<8x256xf32> to vector<8x128xf32>
    %67 = vector.extract_strided_slice %65 {offsets = [0, 128], sizes = [8, 128], strides = [1, 1]} : vector<8x256xf32> to vector<8x128xf32>
    %68 = vector.extract_strided_slice %51 {offsets = [0, 256], sizes = [8, 128], strides = [1, 1]} : vector<8x384xf32> to vector<8x128xf32>
    %69 = vector.extract_strided_slice %57 {offsets = [0, 256], sizes = [8, 128], strides = [1, 1]} : vector<8x384xf32> to vector<8x128xf32>
    %70 = arith.mulf %66, %69 : vector<8x128xf32>
    %71 = arith.addf %68, %70 : vector<8x128xf32>
    %72 = math.tanh %71 : vector<8x128xf32>
    %cst_19 = arith.constant 1.000000e+00 : f32
    %73 = vector.broadcast %cst_19 : f32 to vector<8x128xf32>
    %74 = arith.subf %73, %67 : vector<8x128xf32>
    %75 = arith.mulf %74, %72 : vector<8x128xf32>
    %76 = arith.mulf %67, %48 : vector<8x128xf32>
    %77 = arith.addf %75, %76 : vector<8x128xf32>
    %78 = arith.mulf %54, %77 : vector<8x128xf32>
    %79 = vector.extract_strided_slice %78 {offsets = [0, 0], sizes = [8, 64], strides = [1, 1]} : vector<8x128xf32> to vector<8x64xf32>
    %80 = arith.index_cast %c1_i32 : i32 to index
    %c0_20 = arith.constant 0 : index
    %c0_21 = arith.constant 0 : index
    %81 = vector.load %arg7[%80, %c0_20, %c0_21] : memref<10x8x128xf32, #tpu.memory_space<vmem>>, vector<1x8x64xf32>
    %82 = vector.shape_cast %81 : vector<1x8x64xf32> to vector<8x64xf32>
    %83 = vector.shape_cast %79 : vector<8x64xf32> to vector<1x8x64xf32>
    tpu.vector_store %arg7[%80, %c0_20, %c0_21], %83 {strides = array<i32>} : memref<10x8x128xf32, #tpu.memory_space<vmem>>, vector<1x8x64xf32>,
    %84 = vector.extract_strided_slice %78 {offsets = [0, 64], sizes = [8, 64], strides = [1, 1]} : vector<8x128xf32> to vector<8x64xf32>
    %c9_i32_22 = arith.constant 9 : i32
    %85 = arith.subi %c9_i32_22, %c1_i32 : i32
    %86 = arith.index_cast %85 : i32 to index
    %c0_23 = arith.constant 0 : index
    %c64_24 = arith.constant 64 : index
    %87 = vector.load %arg7[%86, %c0_23, %c64_24] : memref<10x8x128xf32, #tpu.memory_space<vmem>>, vector<1x8x64xf32>
    %88 = vector.shape_cast %87 : vector<1x8x64xf32> to vector<8x64xf32>
    %89 = vector.shape_cast %84 : vector<8x64xf32> to vector<1x8x64xf32>
    tpu.vector_store %arg7[%86, %c0_23, %c64_24], %89 {strides = array<i32>} : memref<10x8x128xf32, #tpu.memory_space<vmem>>, vector<1x8x64xf32>,
    %90 = arith.subf %77, %48 : vector<8x128xf32>
    %91 = arith.mulf %54, %90 : vector<8x128xf32>
    %92 = arith.addf %48, %91 : vector<8x128xf32>
    %c2_i32 = arith.constant 2 : i32
    %93 = arith.index_cast %c2_i32 : i32 to index
    %c0_25 = arith.constant 0 : index
    %c0_26 = arith.constant 0 : index
    %94 = vector.load %arg1[%93, %c0_25, %c0_26] : memref<10x8x384xf32, #tpu.memory_space<vmem>>, vector<1x8x384xf32>
    %95 = vector.shape_cast %94 : vector<1x8x384xf32> to vector<8x384xf32>
    %96 = arith.index_cast %c2_i32 : i32 to index
    %c0_27 = arith.constant 0 : index
    %c0_28 = arith.constant 0 : index
    %97 = vector.load %arg2[%96, %c0_27, %c0_28] : memref<10x8x128xf32, #tpu.memory_space<vmem>>, vector<1x8x128xf32>
    %98 = vector.shape_cast %97 : vector<1x8x128xf32> to vector<8x128xf32>
    %99 = arith.truncf %92 : vector<8x128xf32> to vector<8x128xbf16>
    %cst_29 = arith.constant dense<0.000000e+00> : vector<8x384xf32>
    %100 = tpu.matmul %99, %0, %cst_29 {dimension_numbers = #tpu.dot_dimension_numbers<[1], [0], [0], [1], [0, 0, 1, 1], [], []>} : vector<8x128xbf16>, vector<128x384xbf16>, vector<8x384xf32> -> vector<8x384xf32>
    %101 = arith.addf %100, %3 : vector<8x384xf32>
    %102 = vector.extract_strided_slice %95 {offsets = [0, 0], sizes = [8, 256], strides = [1, 1]} : vector<8x384xf32> to vector<8x256xf32>
    %103 = vector.extract_strided_slice %101 {offsets = [0, 0], sizes = [8, 256], strides = [1, 1]} : vector<8x384xf32> to vector<8x256xf32>
    %104 = arith.addf %102, %103 : vector<8x256xf32>
    %105 = arith.negf %104 : vector<8x256xf32>
    %106 = math.exp %105 : vector<8x256xf32>
    %cst_30 = arith.constant 1.000000e+00 : f32
    %107 = vector.broadcast %cst_30 : f32 to vector<8x256xf32>
    %108 = arith.addf %107, %106 : vector<8x256xf32>
    %109 = arith.divf %107, %108 : vector<8x256xf32>
    %110 = vector.extract_strided_slice %109 {offsets = [0, 0], sizes = [8, 128], strides = [1, 1]} : vector<8x256xf32> to vector<8x128xf32>
    %111 = vector.extract_strided_slice %109 {offsets = [0, 128], sizes = [8, 128], strides = [1, 1]} : vector<8x256xf32> to vector<8x128xf32>
    %112 = vector.extract_strided_slice %95 {offsets = [0, 256], sizes = [8, 128], strides = [1, 1]} : vector<8x384xf32> to vector<8x128xf32>
    %113 = vector.extract_strided_slice %101 {offsets = [0, 256], sizes = [8, 128], strides = [1, 1]} : vector<8x384xf32> to vector<8x128xf32>
    %114 = arith.mulf %110, %113 : vector<8x128xf32>
    %115 = arith.addf %112, %114 : vector<8x128xf32>
    %116 = math.tanh %115 : vector<8x128xf32>
    %cst_31 = arith.constant 1.000000e+00 : f32
    %117 = vector.broadcast %cst_31 : f32 to vector<8x128xf32>
    %118 = arith.subf %117, %111 : vector<8x128xf32>
    %119 = arith.mulf %118, %116 : vector<8x128xf32>
    %120 = arith.mulf %111, %92 : vector<8x128xf32>
    %121 = arith.addf %119, %120 : vector<8x128xf32>
    %122 = arith.mulf %98, %121 : vector<8x128xf32>
    %123 = vector.extract_strided_slice %122 {offsets = [0, 0], sizes = [8, 64], strides = [1, 1]} : vector<8x128xf32> to vector<8x64xf32>
    %124 = arith.index_cast %c2_i32 : i32 to index
    %c0_32 = arith.constant 0 : index
    %c0_33 = arith.constant 0 : index
    %125 = vector.load %arg7[%124, %c0_32, %c0_33] : memref<10x8x128xf32, #tpu.memory_space<vmem>>, vector<1x8x64xf32>
    %126 = vector.shape_cast %125 : vector<1x8x64xf32> to vector<8x64xf32>
    %127 = vector.shape_cast %123 : vector<8x64xf32> to vector<1x8x64xf32>
    tpu.vector_store %arg7[%124, %c0_32, %c0_33], %127 {strides = array<i32>} : memref<10x8x128xf32, #tpu.memory_space<vmem>>, vector<1x8x64xf32>,
    %128 = vector.extract_strided_slice %122 {offsets = [0, 64], sizes = [8, 64], strides = [1, 1]} : vector<8x128xf32> to vector<8x64xf32>
    %c9_i32_34 = arith.constant 9 : i32
    %129 = arith.subi %c9_i32_34, %c2_i32 : i32
    %130 = arith.index_cast %129 : i32 to index
    %c0_35 = arith.constant 0 : index
    %c64_36 = arith.constant 64 : index
    %131 = vector.load %arg7[%130, %c0_35, %c64_36] : memref<10x8x128xf32, #tpu.memory_space<vmem>>, vector<1x8x64xf32>
    %132 = vector.shape_cast %131 : vector<1x8x64xf32> to vector<8x64xf32>
    %133 = vector.shape_cast %128 : vector<8x64xf32> to vector<1x8x64xf32>
    tpu.vector_store %arg7[%130, %c0_35, %c64_36], %133 {strides = array<i32>} : memref<10x8x128xf32, #tpu.memory_space<vmem>>, vector<1x8x64xf32>,
    %134 = arith.subf %121, %92 : vector<8x128xf32>
    %135 = arith.mulf %98, %134 : vector<8x128xf32>
    %136 = arith.addf %92, %135 : vector<8x128xf32>
    %c3_i32 = arith.constant 3 : i32
    %137 = arith.index_cast %c3_i32 : i32 to index
    %c0_37 = arith.constant 0 : index
    %c0_38 = arith.constant 0 : index
    %138 = vector.load %arg1[%137, %c0_37, %c0_38] : memref<10x8x384xf32, #tpu.memory_space<vmem>>, vector<1x8x384xf32>
    %139 = vector.shape_cast %138 : vector<1x8x384xf32> to vector<8x384xf32>
    %140 = arith.index_cast %c3_i32 : i32 to index
    %c0_39 = arith.constant 0 : index
    %c0_40 = arith.constant 0 : index
    %141 = vector.load %arg2[%140, %c0_39, %c0_40] : memref<10x8x128xf32, #tpu.memory_space<vmem>>, vector<1x8x128xf32>
    %142 = vector.shape_cast %141 : vector<1x8x128xf32> to vector<8x128xf32>
    %143 = arith.truncf %136 : vector<8x128xf32> to vector<8x128xbf16>
    %cst_41 = arith.constant dense<0.000000e+00> : vector<8x384xf32>
    %144 = tpu.matmul %143, %0, %cst_41 {dimension_numbers = #tpu.dot_dimension_numbers<[1], [0], [0], [1], [0, 0, 1, 1], [], []>} : vector<8x128xbf16>, vector<128x384xbf16>, vector<8x384xf32> -> vector<8x384xf32>
    %145 = arith.addf %144, %3 : vector<8x384xf32>
    %146 = vector.extract_strided_slice %139 {offsets = [0, 0], sizes = [8, 256], strides = [1, 1]} : vector<8x384xf32> to vector<8x256xf32>
    %147 = vector.extract_strided_slice %145 {offsets = [0, 0], sizes = [8, 256], strides = [1, 1]} : vector<8x384xf32> to vector<8x256xf32>
    %148 = arith.addf %146, %147 : vector<8x256xf32>
    %149 = arith.negf %148 : vector<8x256xf32>
    %150 = math.exp %149 : vector<8x256xf32>
    %cst_42 = arith.constant 1.000000e+00 : f32
    %151 = vector.broadcast %cst_42 : f32 to vector<8x256xf32>
    %152 = arith.addf %151, %150 : vector<8x256xf32>
    %153 = arith.divf %151, %152 : vector<8x256xf32>
    %154 = vector.extract_strided_slice %153 {offsets = [0, 0], sizes = [8, 128], strides = [1, 1]} : vector<8x256xf32> to vector<8x128xf32>
    %155 = vector.extract_strided_slice %153 {offsets = [0, 128], sizes = [8, 128], strides = [1, 1]} : vector<8x256xf32> to vector<8x128xf32>
    %156 = vector.extract_strided_slice %139 {offsets = [0, 256], sizes = [8, 128], strides = [1, 1]} : vector<8x384xf32> to vector<8x128xf32>
    %157 = vector.extract_strided_slice %145 {offsets = [0, 256], sizes = [8, 128], strides = [1, 1]} : vector<8x384xf32> to vector<8x128xf32>
    %158 = arith.mulf %154, %157 : vector<8x128xf32>
    %159 = arith.addf %156, %158 : vector<8x128xf32>
    %160 = math.tanh %159 : vector<8x128xf32>
    %cst_43 = arith.constant 1.000000e+00 : f32
    %161 = vector.broadcast %cst_43 : f32 to vector<8x128xf32>
    %162 = arith.subf %161, %155 : vector<8x128xf32>
    %163 = arith.mulf %162, %160 : vector<8x128xf32>
    %164 = arith.mulf %155, %136 : vector<8x128xf32>
    %165 = arith.addf %163, %164 : vector<8x128xf32>
    %166 = arith.mulf %142, %165 : vector<8x128xf32>
    %167 = vector.extract_strided_slice %166 {offsets = [0, 0], sizes = [8, 64], strides = [1, 1]} : vector<8x128xf32> to vector<8x64xf32>
    %168 = arith.index_cast %c3_i32 : i32 to index
    %c0_44 = arith.constant 0 : index
    %c0_45 = arith.constant 0 : index
    %169 = vector.load %arg7[%168, %c0_44, %c0_45] : memref<10x8x128xf32, #tpu.memory_space<vmem>>, vector<1x8x64xf32>
    %170 = vector.shape_cast %169 : vector<1x8x64xf32> to vector<8x64xf32>
    %171 = vector.shape_cast %167 : vector<8x64xf32> to vector<1x8x64xf32>
    tpu.vector_store %arg7[%168, %c0_44, %c0_45], %171 {strides = array<i32>} : memref<10x8x128xf32, #tpu.memory_space<vmem>>, vector<1x8x64xf32>,
    %172 = vector.extract_strided_slice %166 {offsets = [0, 64], sizes = [8, 64], strides = [1, 1]} : vector<8x128xf32> to vector<8x64xf32>
    %c9_i32_46 = arith.constant 9 : i32
    %173 = arith.subi %c9_i32_46, %c3_i32 : i32
    %174 = arith.index_cast %173 : i32 to index
    %c0_47 = arith.constant 0 : index
    %c64_48 = arith.constant 64 : index
    %175 = vector.load %arg7[%174, %c0_47, %c64_48] : memref<10x8x128xf32, #tpu.memory_space<vmem>>, vector<1x8x64xf32>
    %176 = vector.shape_cast %175 : vector<1x8x64xf32> to vector<8x64xf32>
    %177 = vector.shape_cast %172 : vector<8x64xf32> to vector<1x8x64xf32>
    tpu.vector_store %arg7[%174, %c0_47, %c64_48], %177 {strides = array<i32>} : memref<10x8x128xf32, #tpu.memory_space<vmem>>, vector<1x8x64xf32>,
    %178 = arith.subf %165, %136 : vector<8x128xf32>
    %179 = arith.mulf %142, %178 : vector<8x128xf32>
    %180 = arith.addf %136, %179 : vector<8x128xf32>
    %c4_i32 = arith.constant 4 : i32
    %181 = arith.index_cast %c4_i32 : i32 to index
    %c0_49 = arith.constant 0 : index
    %c0_50 = arith.constant 0 : index
    %182 = vector.load %arg1[%181, %c0_49, %c0_50] : memref<10x8x384xf32, #tpu.memory_space<vmem>>, vector<1x8x384xf32>
    %183 = vector.shape_cast %182 : vector<1x8x384xf32> to vector<8x384xf32>
    %184 = arith.index_cast %c4_i32 : i32 to index
    %c0_51 = arith.constant 0 : index
    %c0_52 = arith.constant 0 : index
    %185 = vector.load %arg2[%184, %c0_51, %c0_52] : memref<10x8x128xf32, #tpu.memory_space<vmem>>, vector<1x8x128xf32>
    %186 = vector.shape_cast %185 : vector<1x8x128xf32> to vector<8x128xf32>
    %187 = arith.truncf %180 : vector<8x128xf32> to vector<8x128xbf16>
    %cst_53 = arith.constant dense<0.000000e+00> : vector<8x384xf32>
    %188 = tpu.matmul %187, %0, %cst_53 {dimension_numbers = #tpu.dot_dimension_numbers<[1], [0], [0], [1], [0, 0, 1, 1], [], []>} : vector<8x128xbf16>, vector<128x384xbf16>, vector<8x384xf32> -> vector<8x384xf32>
    %189 = arith.addf %188, %3 : vector<8x384xf32>
    %190 = vector.extract_strided_slice %183 {offsets = [0, 0], sizes = [8, 256], strides = [1, 1]} : vector<8x384xf32> to vector<8x256xf32>
    %191 = vector.extract_strided_slice %189 {offsets = [0, 0], sizes = [8, 256], strides = [1, 1]} : vector<8x384xf32> to vector<8x256xf32>
    %192 = arith.addf %190, %191 : vector<8x256xf32>
    %193 = arith.negf %192 : vector<8x256xf32>
    %194 = math.exp %193 : vector<8x256xf32>
    %cst_54 = arith.constant 1.000000e+00 : f32
    %195 = vector.broadcast %cst_54 : f32 to vector<8x256xf32>
    %196 = arith.addf %195, %194 : vector<8x256xf32>
    %197 = arith.divf %195, %196 : vector<8x256xf32>
    %198 = vector.extract_strided_slice %197 {offsets = [0, 0], sizes = [8, 128], strides = [1, 1]} : vector<8x256xf32> to vector<8x128xf32>
    %199 = vector.extract_strided_slice %197 {offsets = [0, 128], sizes = [8, 128], strides = [1, 1]} : vector<8x256xf32> to vector<8x128xf32>
    %200 = vector.extract_strided_slice %183 {offsets = [0, 256], sizes = [8, 128], strides = [1, 1]} : vector<8x384xf32> to vector<8x128xf32>
    %201 = vector.extract_strided_slice %189 {offsets = [0, 256], sizes = [8, 128], strides = [1, 1]} : vector<8x384xf32> to vector<8x128xf32>
    %202 = arith.mulf %198, %201 : vector<8x128xf32>
    %203 = arith.addf %200, %202 : vector<8x128xf32>
    %204 = math.tanh %203 : vector<8x128xf32>
    %cst_55 = arith.constant 1.000000e+00 : f32
    %205 = vector.broadcast %cst_55 : f32 to vector<8x128xf32>
    %206 = arith.subf %205, %199 : vector<8x128xf32>
    %207 = arith.mulf %206, %204 : vector<8x128xf32>
    %208 = arith.mulf %199, %180 : vector<8x128xf32>
    %209 = arith.addf %207, %208 : vector<8x128xf32>
    %210 = arith.mulf %186, %209 : vector<8x128xf32>
    %211 = vector.extract_strided_slice %210 {offsets = [0, 0], sizes = [8, 64], strides = [1, 1]} : vector<8x128xf32> to vector<8x64xf32>
    %212 = arith.index_cast %c4_i32 : i32 to index
    %c0_56 = arith.constant 0 : index
    %c0_57 = arith.constant 0 : index
    %213 = vector.load %arg7[%212, %c0_56, %c0_57] : memref<10x8x128xf32, #tpu.memory_space<vmem>>, vector<1x8x64xf32>
    %214 = vector.shape_cast %213 : vector<1x8x64xf32> to vector<8x64xf32>
    %215 = vector.shape_cast %211 : vector<8x64xf32> to vector<1x8x64xf32>
    tpu.vector_store %arg7[%212, %c0_56, %c0_57], %215 {strides = array<i32>} : memref<10x8x128xf32, #tpu.memory_space<vmem>>, vector<1x8x64xf32>,
    %216 = vector.extract_strided_slice %210 {offsets = [0, 64], sizes = [8, 64], strides = [1, 1]} : vector<8x128xf32> to vector<8x64xf32>
    %c9_i32_58 = arith.constant 9 : i32
    %217 = arith.subi %c9_i32_58, %c4_i32 : i32
    %218 = arith.index_cast %217 : i32 to index
    %c0_59 = arith.constant 0 : index
    %c64_60 = arith.constant 64 : index
    %219 = vector.load %arg7[%218, %c0_59, %c64_60] : memref<10x8x128xf32, #tpu.memory_space<vmem>>, vector<1x8x64xf32>
    %220 = vector.shape_cast %219 : vector<1x8x64xf32> to vector<8x64xf32>
    %221 = vector.shape_cast %216 : vector<8x64xf32> to vector<1x8x64xf32>
    tpu.vector_store %arg7[%218, %c0_59, %c64_60], %221 {strides = array<i32>} : memref<10x8x128xf32, #tpu.memory_space<vmem>>, vector<1x8x64xf32>,
    %222 = arith.subf %209, %180 : vector<8x128xf32>
    %223 = arith.mulf %186, %222 : vector<8x128xf32>
    %224 = arith.addf %180, %223 : vector<8x128xf32>
    %c5_i32 = arith.constant 5 : i32
    %225 = arith.index_cast %c5_i32 : i32 to index
    %c0_61 = arith.constant 0 : index
    %c0_62 = arith.constant 0 : index
    %226 = vector.load %arg1[%225, %c0_61, %c0_62] : memref<10x8x384xf32, #tpu.memory_space<vmem>>, vector<1x8x384xf32>
    %227 = vector.shape_cast %226 : vector<1x8x384xf32> to vector<8x384xf32>
    %228 = arith.index_cast %c5_i32 : i32 to index
    %c0_63 = arith.constant 0 : index
    %c0_64 = arith.constant 0 : index
    %229 = vector.load %arg2[%228, %c0_63, %c0_64] : memref<10x8x128xf32, #tpu.memory_space<vmem>>, vector<1x8x128xf32>
    %230 = vector.shape_cast %229 : vector<1x8x128xf32> to vector<8x128xf32>
    %231 = arith.truncf %224 : vector<8x128xf32> to vector<8x128xbf16>
    %cst_65 = arith.constant dense<0.000000e+00> : vector<8x384xf32>
    %232 = tpu.matmul %231, %0, %cst_65 {dimension_numbers = #tpu.dot_dimension_numbers<[1], [0], [0], [1], [0, 0, 1, 1], [], []>} : vector<8x128xbf16>, vector<128x384xbf16>, vector<8x384xf32> -> vector<8x384xf32>
    %233 = arith.addf %232, %3 : vector<8x384xf32>
    %234 = vector.extract_strided_slice %227 {offsets = [0, 0], sizes = [8, 256], strides = [1, 1]} : vector<8x384xf32> to vector<8x256xf32>
    %235 = vector.extract_strided_slice %233 {offsets = [0, 0], sizes = [8, 256], strides = [1, 1]} : vector<8x384xf32> to vector<8x256xf32>
    %236 = arith.addf %234, %235 : vector<8x256xf32>
    %237 = arith.negf %236 : vector<8x256xf32>
    %238 = math.exp %237 : vector<8x256xf32>
    %cst_66 = arith.constant 1.000000e+00 : f32
    %239 = vector.broadcast %cst_66 : f32 to vector<8x256xf32>
    %240 = arith.addf %239, %238 : vector<8x256xf32>
    %241 = arith.divf %239, %240 : vector<8x256xf32>
    %242 = vector.extract_strided_slice %241 {offsets = [0, 0], sizes = [8, 128], strides = [1, 1]} : vector<8x256xf32> to vector<8x128xf32>
    %243 = vector.extract_strided_slice %241 {offsets = [0, 128], sizes = [8, 128], strides = [1, 1]} : vector<8x256xf32> to vector<8x128xf32>
    %244 = vector.extract_strided_slice %227 {offsets = [0, 256], sizes = [8, 128], strides = [1, 1]} : vector<8x384xf32> to vector<8x128xf32>
    %245 = vector.extract_strided_slice %233 {offsets = [0, 256], sizes = [8, 128], strides = [1, 1]} : vector<8x384xf32> to vector<8x128xf32>
    %246 = arith.mulf %242, %245 : vector<8x128xf32>
    %247 = arith.addf %244, %246 : vector<8x128xf32>
    %248 = math.tanh %247 : vector<8x128xf32>
    %cst_67 = arith.constant 1.000000e+00 : f32
    %249 = vector.broadcast %cst_67 : f32 to vector<8x128xf32>
    %250 = arith.subf %249, %243 : vector<8x128xf32>
    %251 = arith.mulf %250, %248 : vector<8x128xf32>
    %252 = arith.mulf %243, %224 : vector<8x128xf32>
    %253 = arith.addf %251, %252 : vector<8x128xf32>
    %254 = arith.mulf %230, %253 : vector<8x128xf32>
    %255 = vector.extract_strided_slice %254 {offsets = [0, 0], sizes = [8, 64], strides = [1, 1]} : vector<8x128xf32> to vector<8x64xf32>
    %256 = arith.index_cast %c5_i32 : i32 to index
    %c0_68 = arith.constant 0 : index
    %c0_69 = arith.constant 0 : index
    %257 = vector.load %arg7[%256, %c0_68, %c0_69] : memref<10x8x128xf32, #tpu.memory_space<vmem>>, vector<1x8x64xf32>
    %258 = vector.shape_cast %257 : vector<1x8x64xf32> to vector<8x64xf32>
    %259 = vector.shape_cast %255 : vector<8x64xf32> to vector<1x8x64xf32>
    tpu.vector_store %arg7[%256, %c0_68, %c0_69], %259 {strides = array<i32>} : memref<10x8x128xf32, #tpu.memory_space<vmem>>, vector<1x8x64xf32>,
    %260 = vector.extract_strided_slice %254 {offsets = [0, 64], sizes = [8, 64], strides = [1, 1]} : vector<8x128xf32> to vector<8x64xf32>
    %c9_i32_70 = arith.constant 9 : i32
    %261 = arith.subi %c9_i32_70, %c5_i32 : i32
    %262 = arith.index_cast %261 : i32 to index
    %c0_71 = arith.constant 0 : index
    %c64_72 = arith.constant 64 : index
    %263 = vector.load %arg7[%262, %c0_71, %c64_72] : memref<10x8x128xf32, #tpu.memory_space<vmem>>, vector<1x8x64xf32>
    %264 = vector.shape_cast %263 : vector<1x8x64xf32> to vector<8x64xf32>
    %265 = vector.shape_cast %260 : vector<8x64xf32> to vector<1x8x64xf32>
    tpu.vector_store %arg7[%262, %c0_71, %c64_72], %265 {strides = array<i32>} : memref<10x8x128xf32, #tpu.memory_space<vmem>>, vector<1x8x64xf32>,
    %266 = arith.subf %253, %224 : vector<8x128xf32>
    %267 = arith.mulf %230, %266 : vector<8x128xf32>
    %268 = arith.addf %224, %267 : vector<8x128xf32>
    %c6_i32 = arith.constant 6 : i32
    %269 = arith.index_cast %c6_i32 : i32 to index
    %c0_73 = arith.constant 0 : index
    %c0_74 = arith.constant 0 : index
    %270 = vector.load %arg1[%269, %c0_73, %c0_74] : memref<10x8x384xf32, #tpu.memory_space<vmem>>, vector<1x8x384xf32>
    %271 = vector.shape_cast %270 : vector<1x8x384xf32> to vector<8x384xf32>
    %272 = arith.index_cast %c6_i32 : i32 to index
    %c0_75 = arith.constant 0 : index
    %c0_76 = arith.constant 0 : index
    %273 = vector.load %arg2[%272, %c0_75, %c0_76] : memref<10x8x128xf32, #tpu.memory_space<vmem>>, vector<1x8x128xf32>
    %274 = vector.shape_cast %273 : vector<1x8x128xf32> to vector<8x128xf32>
    %275 = arith.truncf %268 : vector<8x128xf32> to vector<8x128xbf16>
    %cst_77 = arith.constant dense<0.000000e+00> : vector<8x384xf32>
    %276 = tpu.matmul %275, %0, %cst_77 {dimension_numbers = #tpu.dot_dimension_numbers<[1], [0], [0], [1], [0, 0, 1, 1], [], []>} : vector<8x128xbf16>, vector<128x384xbf16>, vector<8x384xf32> -> vector<8x384xf32>
    %277 = arith.addf %276, %3 : vector<8x384xf32>
    %278 = vector.extract_strided_slice %271 {offsets = [0, 0], sizes = [8, 256], strides = [1, 1]} : vector<8x384xf32> to vector<8x256xf32>
    %279 = vector.extract_strided_slice %277 {offsets = [0, 0], sizes = [8, 256], strides = [1, 1]} : vector<8x384xf32> to vector<8x256xf32>
    %280 = arith.addf %278, %279 : vector<8x256xf32>
    %281 = arith.negf %280 : vector<8x256xf32>
    %282 = math.exp %281 : vector<8x256xf32>
    %cst_78 = arith.constant 1.000000e+00 : f32
    %283 = vector.broadcast %cst_78 : f32 to vector<8x256xf32>
    %284 = arith.addf %283, %282 : vector<8x256xf32>
    %285 = arith.divf %283, %284 : vector<8x256xf32>
    %286 = vector.extract_strided_slice %285 {offsets = [0, 0], sizes = [8, 128], strides = [1, 1]} : vector<8x256xf32> to vector<8x128xf32>
    %287 = vector.extract_strided_slice %285 {offsets = [0, 128], sizes = [8, 128], strides = [1, 1]} : vector<8x256xf32> to vector<8x128xf32>
    %288 = vector.extract_strided_slice %271 {offsets = [0, 256], sizes = [8, 128], strides = [1, 1]} : vector<8x384xf32> to vector<8x128xf32>
    %289 = vector.extract_strided_slice %277 {offsets = [0, 256], sizes = [8, 128], strides = [1, 1]} : vector<8x384xf32> to vector<8x128xf32>
    %290 = arith.mulf %286, %289 : vector<8x128xf32>
    %291 = arith.addf %288, %290 : vector<8x128xf32>
    %292 = math.tanh %291 : vector<8x128xf32>
    %cst_79 = arith.constant 1.000000e+00 : f32
    %293 = vector.broadcast %cst_79 : f32 to vector<8x128xf32>
    %294 = arith.subf %293, %287 : vector<8x128xf32>
    %295 = arith.mulf %294, %292 : vector<8x128xf32>
    %296 = arith.mulf %287, %268 : vector<8x128xf32>
    %297 = arith.addf %295, %296 : vector<8x128xf32>
    %298 = arith.mulf %274, %297 : vector<8x128xf32>
    %299 = vector.extract_strided_slice %298 {offsets = [0, 0], sizes = [8, 64], strides = [1, 1]} : vector<8x128xf32> to vector<8x64xf32>
    %300 = arith.index_cast %c6_i32 : i32 to index
    %c0_80 = arith.constant 0 : index
    %c0_81 = arith.constant 0 : index
    %301 = vector.load %arg7[%300, %c0_80, %c0_81] : memref<10x8x128xf32, #tpu.memory_space<vmem>>, vector<1x8x64xf32>
    %302 = vector.shape_cast %301 : vector<1x8x64xf32> to vector<8x64xf32>
    %303 = vector.shape_cast %299 : vector<8x64xf32> to vector<1x8x64xf32>
    tpu.vector_store %arg7[%300, %c0_80, %c0_81], %303 {strides = array<i32>} : memref<10x8x128xf32, #tpu.memory_space<vmem>>, vector<1x8x64xf32>,
    %304 = vector.extract_strided_slice %298 {offsets = [0, 64], sizes = [8, 64], strides = [1, 1]} : vector<8x128xf32> to vector<8x64xf32>
    %c9_i32_82 = arith.constant 9 : i32
    %305 = arith.subi %c9_i32_82, %c6_i32 : i32
    %306 = arith.index_cast %305 : i32 to index
    %c0_83 = arith.constant 0 : index
    %c64_84 = arith.constant 64 : index
    %307 = vector.load %arg7[%306, %c0_83, %c64_84] : memref<10x8x128xf32, #tpu.memory_space<vmem>>, vector<1x8x64xf32>
    %308 = vector.shape_cast %307 : vector<1x8x64xf32> to vector<8x64xf32>
    %309 = vector.shape_cast %304 : vector<8x64xf32> to vector<1x8x64xf32>
    tpu.vector_store %arg7[%306, %c0_83, %c64_84], %309 {strides = array<i32>} : memref<10x8x128xf32, #tpu.memory_space<vmem>>, vector<1x8x64xf32>,
    %310 = arith.subf %297, %268 : vector<8x128xf32>
    %311 = arith.mulf %274, %310 : vector<8x128xf32>
    %312 = arith.addf %268, %311 : vector<8x128xf32>
    %c7_i32 = arith.constant 7 : i32
    %313 = arith.index_cast %c7_i32 : i32 to index
    %c0_85 = arith.constant 0 : index
    %c0_86 = arith.constant 0 : index
    %314 = vector.load %arg1[%313, %c0_85, %c0_86] : memref<10x8x384xf32, #tpu.memory_space<vmem>>, vector<1x8x384xf32>
    %315 = vector.shape_cast %314 : vector<1x8x384xf32> to vector<8x384xf32>
    %316 = arith.index_cast %c7_i32 : i32 to index
    %c0_87 = arith.constant 0 : index
    %c0_88 = arith.constant 0 : index
    %317 = vector.load %arg2[%316, %c0_87, %c0_88] : memref<10x8x128xf32, #tpu.memory_space<vmem>>, vector<1x8x128xf32>
    %318 = vector.shape_cast %317 : vector<1x8x128xf32> to vector<8x128xf32>
    %319 = arith.truncf %312 : vector<8x128xf32> to vector<8x128xbf16>
    %cst_89 = arith.constant dense<0.000000e+00> : vector<8x384xf32>
    %320 = tpu.matmul %319, %0, %cst_89 {dimension_numbers = #tpu.dot_dimension_numbers<[1], [0], [0], [1], [0, 0, 1, 1], [], []>} : vector<8x128xbf16>, vector<128x384xbf16>, vector<8x384xf32> -> vector<8x384xf32>
    %321 = arith.addf %320, %3 : vector<8x384xf32>
    %322 = vector.extract_strided_slice %315 {offsets = [0, 0], sizes = [8, 256], strides = [1, 1]} : vector<8x384xf32> to vector<8x256xf32>
    %323 = vector.extract_strided_slice %321 {offsets = [0, 0], sizes = [8, 256], strides = [1, 1]} : vector<8x384xf32> to vector<8x256xf32>
    %324 = arith.addf %322, %323 : vector<8x256xf32>
    %325 = arith.negf %324 : vector<8x256xf32>
    %326 = math.exp %325 : vector<8x256xf32>
    %cst_90 = arith.constant 1.000000e+00 : f32
    %327 = vector.broadcast %cst_90 : f32 to vector<8x256xf32>
    %328 = arith.addf %327, %326 : vector<8x256xf32>
    %329 = arith.divf %327, %328 : vector<8x256xf32>
    %330 = vector.extract_strided_slice %329 {offsets = [0, 0], sizes = [8, 128], strides = [1, 1]} : vector<8x256xf32> to vector<8x128xf32>
    %331 = vector.extract_strided_slice %329 {offsets = [0, 128], sizes = [8, 128], strides = [1, 1]} : vector<8x256xf32> to vector<8x128xf32>
    %332 = vector.extract_strided_slice %315 {offsets = [0, 256], sizes = [8, 128], strides = [1, 1]} : vector<8x384xf32> to vector<8x128xf32>
    %333 = vector.extract_strided_slice %321 {offsets = [0, 256], sizes = [8, 128], strides = [1, 1]} : vector<8x384xf32> to vector<8x128xf32>
    %334 = arith.mulf %330, %333 : vector<8x128xf32>
    %335 = arith.addf %332, %334 : vector<8x128xf32>
    %336 = math.tanh %335 : vector<8x128xf32>
    %cst_91 = arith.constant 1.000000e+00 : f32
    %337 = vector.broadcast %cst_91 : f32 to vector<8x128xf32>
    %338 = arith.subf %337, %331 : vector<8x128xf32>
    %339 = arith.mulf %338, %336 : vector<8x128xf32>
    %340 = arith.mulf %331, %312 : vector<8x128xf32>
    %341 = arith.addf %339, %340 : vector<8x128xf32>
    %342 = arith.mulf %318, %341 : vector<8x128xf32>
    %343 = vector.extract_strided_slice %342 {offsets = [0, 0], sizes = [8, 64], strides = [1, 1]} : vector<8x128xf32> to vector<8x64xf32>
    %344 = arith.index_cast %c7_i32 : i32 to index
    %c0_92 = arith.constant 0 : index
    %c0_93 = arith.constant 0 : index
    %345 = vector.load %arg7[%344, %c0_92, %c0_93] : memref<10x8x128xf32, #tpu.memory_space<vmem>>, vector<1x8x64xf32>
    %346 = vector.shape_cast %345 : vector<1x8x64xf32> to vector<8x64xf32>
    %347 = vector.shape_cast %343 : vector<8x64xf32> to vector<1x8x64xf32>
    tpu.vector_store %arg7[%344, %c0_92, %c0_93], %347 {strides = array<i32>} : memref<10x8x128xf32, #tpu.memory_space<vmem>>, vector<1x8x64xf32>,
    %348 = vector.extract_strided_slice %342 {offsets = [0, 64], sizes = [8, 64], strides = [1, 1]} : vector<8x128xf32> to vector<8x64xf32>
    %c9_i32_94 = arith.constant 9 : i32
    %349 = arith.subi %c9_i32_94, %c7_i32 : i32
    %350 = arith.index_cast %349 : i32 to index
    %c0_95 = arith.constant 0 : index
    %c64_96 = arith.constant 64 : index
    %351 = vector.load %arg7[%350, %c0_95, %c64_96] : memref<10x8x128xf32, #tpu.memory_space<vmem>>, vector<1x8x64xf32>
    %352 = vector.shape_cast %351 : vector<1x8x64xf32> to vector<8x64xf32>
    %353 = vector.shape_cast %348 : vector<8x64xf32> to vector<1x8x64xf32>
    tpu.vector_store %arg7[%350, %c0_95, %c64_96], %353 {strides = array<i32>} : memref<10x8x128xf32, #tpu.memory_space<vmem>>, vector<1x8x64xf32>,
    %354 = arith.subf %341, %312 : vector<8x128xf32>
    %355 = arith.mulf %318, %354 : vector<8x128xf32>
    %356 = arith.addf %312, %355 : vector<8x128xf32>
    %c8_i32 = arith.constant 8 : i32
    %357 = arith.index_cast %c8_i32 : i32 to index
    %c0_97 = arith.constant 0 : index
    %c0_98 = arith.constant 0 : index
    %358 = vector.load %arg1[%357, %c0_97, %c0_98] : memref<10x8x384xf32, #tpu.memory_space<vmem>>, vector<1x8x384xf32>
    %359 = vector.shape_cast %358 : vector<1x8x384xf32> to vector<8x384xf32>
    %360 = arith.index_cast %c8_i32 : i32 to index
    %c0_99 = arith.constant 0 : index
    %c0_100 = arith.constant 0 : index
    %361 = vector.load %arg2[%360, %c0_99, %c0_100] : memref<10x8x128xf32, #tpu.memory_space<vmem>>, vector<1x8x128xf32>
    %362 = vector.shape_cast %361 : vector<1x8x128xf32> to vector<8x128xf32>
    %363 = arith.truncf %356 : vector<8x128xf32> to vector<8x128xbf16>
    %cst_101 = arith.constant dense<0.000000e+00> : vector<8x384xf32>
    %364 = tpu.matmul %363, %0, %cst_101 {dimension_numbers = #tpu.dot_dimension_numbers<[1], [0], [0], [1], [0, 0, 1, 1], [], []>} : vector<8x128xbf16>, vector<128x384xbf16>, vector<8x384xf32> -> vector<8x384xf32>
    %365 = arith.addf %364, %3 : vector<8x384xf32>
    %366 = vector.extract_strided_slice %359 {offsets = [0, 0], sizes = [8, 256], strides = [1, 1]} : vector<8x384xf32> to vector<8x256xf32>
    %367 = vector.extract_strided_slice %365 {offsets = [0, 0], sizes = [8, 256], strides = [1, 1]} : vector<8x384xf32> to vector<8x256xf32>
    %368 = arith.addf %366, %367 : vector<8x256xf32>
    %369 = arith.negf %368 : vector<8x256xf32>
    %370 = math.exp %369 : vector<8x256xf32>
    %cst_102 = arith.constant 1.000000e+00 : f32
    %371 = vector.broadcast %cst_102 : f32 to vector<8x256xf32>
    %372 = arith.addf %371, %370 : vector<8x256xf32>
    %373 = arith.divf %371, %372 : vector<8x256xf32>
    %374 = vector.extract_strided_slice %373 {offsets = [0, 0], sizes = [8, 128], strides = [1, 1]} : vector<8x256xf32> to vector<8x128xf32>
    %375 = vector.extract_strided_slice %373 {offsets = [0, 128], sizes = [8, 128], strides = [1, 1]} : vector<8x256xf32> to vector<8x128xf32>
    %376 = vector.extract_strided_slice %359 {offsets = [0, 256], sizes = [8, 128], strides = [1, 1]} : vector<8x384xf32> to vector<8x128xf32>
    %377 = vector.extract_strided_slice %365 {offsets = [0, 256], sizes = [8, 128], strides = [1, 1]} : vector<8x384xf32> to vector<8x128xf32>
    %378 = arith.mulf %374, %377 : vector<8x128xf32>
    %379 = arith.addf %376, %378 : vector<8x128xf32>
    %380 = math.tanh %379 : vector<8x128xf32>
    %cst_103 = arith.constant 1.000000e+00 : f32
    %381 = vector.broadcast %cst_103 : f32 to vector<8x128xf32>
    %382 = arith.subf %381, %375 : vector<8x128xf32>
    %383 = arith.mulf %382, %380 : vector<8x128xf32>
    %384 = arith.mulf %375, %356 : vector<8x128xf32>
    %385 = arith.addf %383, %384 : vector<8x128xf32>
    %386 = arith.mulf %362, %385 : vector<8x128xf32>
    %387 = vector.extract_strided_slice %386 {offsets = [0, 0], sizes = [8, 64], strides = [1, 1]} : vector<8x128xf32> to vector<8x64xf32>
    %388 = arith.index_cast %c8_i32 : i32 to index
    %c0_104 = arith.constant 0 : index
    %c0_105 = arith.constant 0 : index
    %389 = vector.load %arg7[%388, %c0_104, %c0_105] : memref<10x8x128xf32, #tpu.memory_space<vmem>>, vector<1x8x64xf32>
    %390 = vector.shape_cast %389 : vector<1x8x64xf32> to vector<8x64xf32>
    %391 = vector.shape_cast %387 : vector<8x64xf32> to vector<1x8x64xf32>
    tpu.vector_store %arg7[%388, %c0_104, %c0_105], %391 {strides = array<i32>} : memref<10x8x128xf32, #tpu.memory_space<vmem>>, vector<1x8x64xf32>,
    %392 = vector.extract_strided_slice %386 {offsets = [0, 64], sizes = [8, 64], strides = [1, 1]} : vector<8x128xf32> to vector<8x64xf32>
    %c9_i32_106 = arith.constant 9 : i32
    %393 = arith.subi %c9_i32_106, %c8_i32 : i32
    %394 = arith.index_cast %393 : i32 to index
    %c0_107 = arith.constant 0 : index
    %c64_108 = arith.constant 64 : index
    %395 = vector.load %arg7[%394, %c0_107, %c64_108] : memref<10x8x128xf32, #tpu.memory_space<vmem>>, vector<1x8x64xf32>
    %396 = vector.shape_cast %395 : vector<1x8x64xf32> to vector<8x64xf32>
    %397 = vector.shape_cast %392 : vector<8x64xf32> to vector<1x8x64xf32>
    tpu.vector_store %arg7[%394, %c0_107, %c64_108], %397 {strides = array<i32>} : memref<10x8x128xf32, #tpu.memory_space<vmem>>, vector<1x8x64xf32>,
    %398 = arith.subf %385, %356 : vector<8x128xf32>
    %399 = arith.mulf %362, %398 : vector<8x128xf32>
    %400 = arith.addf %356, %399 : vector<8x128xf32>
    %c9_i32_109 = arith.constant 9 : i32
    %401 = arith.index_cast %c9_i32_109 : i32 to index
    %c0_110 = arith.constant 0 : index
    %c0_111 = arith.constant 0 : index
    %402 = vector.load %arg1[%401, %c0_110, %c0_111] : memref<10x8x384xf32, #tpu.memory_space<vmem>>, vector<1x8x384xf32>
    %403 = vector.shape_cast %402 : vector<1x8x384xf32> to vector<8x384xf32>
    %404 = arith.index_cast %c9_i32_109 : i32 to index
    %c0_112 = arith.constant 0 : index
    %c0_113 = arith.constant 0 : index
    %405 = vector.load %arg2[%404, %c0_112, %c0_113] : memref<10x8x128xf32, #tpu.memory_space<vmem>>, vector<1x8x128xf32>
    %406 = vector.shape_cast %405 : vector<1x8x128xf32> to vector<8x128xf32>
    %407 = arith.truncf %400 : vector<8x128xf32> to vector<8x128xbf16>
    %cst_114 = arith.constant dense<0.000000e+00> : vector<8x384xf32>
    %408 = tpu.matmul %407, %0, %cst_114 {dimension_numbers = #tpu.dot_dimension_numbers<[1], [0], [0], [1], [0, 0, 1, 1], [], []>} : vector<8x128xbf16>, vector<128x384xbf16>, vector<8x384xf32> -> vector<8x384xf32>
    %409 = arith.addf %408, %3 : vector<8x384xf32>
    %410 = vector.extract_strided_slice %403 {offsets = [0, 0], sizes = [8, 256], strides = [1, 1]} : vector<8x384xf32> to vector<8x256xf32>
    %411 = vector.extract_strided_slice %409 {offsets = [0, 0], sizes = [8, 256], strides = [1, 1]} : vector<8x384xf32> to vector<8x256xf32>
    %412 = arith.addf %410, %411 : vector<8x256xf32>
    %413 = arith.negf %412 : vector<8x256xf32>
    %414 = math.exp %413 : vector<8x256xf32>
    %cst_115 = arith.constant 1.000000e+00 : f32
    %415 = vector.broadcast %cst_115 : f32 to vector<8x256xf32>
    %416 = arith.addf %415, %414 : vector<8x256xf32>
    %417 = arith.divf %415, %416 : vector<8x256xf32>
    %418 = vector.extract_strided_slice %417 {offsets = [0, 0], sizes = [8, 128], strides = [1, 1]} : vector<8x256xf32> to vector<8x128xf32>
    %419 = vector.extract_strided_slice %417 {offsets = [0, 128], sizes = [8, 128], strides = [1, 1]} : vector<8x256xf32> to vector<8x128xf32>
    %420 = vector.extract_strided_slice %403 {offsets = [0, 256], sizes = [8, 128], strides = [1, 1]} : vector<8x384xf32> to vector<8x128xf32>
    %421 = vector.extract_strided_slice %409 {offsets = [0, 256], sizes = [8, 128], strides = [1, 1]} : vector<8x384xf32> to vector<8x128xf32>
    %422 = arith.mulf %418, %421 : vector<8x128xf32>
    %423 = arith.addf %420, %422 : vector<8x128xf32>
    %424 = math.tanh %423 : vector<8x128xf32>
    %cst_116 = arith.constant 1.000000e+00 : f32
    %425 = vector.broadcast %cst_116 : f32 to vector<8x128xf32>
    %426 = arith.subf %425, %419 : vector<8x128xf32>
    %427 = arith.mulf %426, %424 : vector<8x128xf32>
    %428 = arith.mulf %419, %400 : vector<8x128xf32>
    %429 = arith.addf %427, %428 : vector<8x128xf32>
    %430 = arith.mulf %406, %429 : vector<8x128xf32>
    %431 = vector.extract_strided_slice %430 {offsets = [0, 0], sizes = [8, 64], strides = [1, 1]} : vector<8x128xf32> to vector<8x64xf32>
    %432 = arith.index_cast %c9_i32_109 : i32 to index
    %c0_117 = arith.constant 0 : index
    %c0_118 = arith.constant 0 : index
    %433 = vector.load %arg7[%432, %c0_117, %c0_118] : memref<10x8x128xf32, #tpu.memory_space<vmem>>, vector<1x8x64xf32>
    %434 = vector.shape_cast %433 : vector<1x8x64xf32> to vector<8x64xf32>
    %435 = vector.shape_cast %431 : vector<8x64xf32> to vector<1x8x64xf32>
    tpu.vector_store %arg7[%432, %c0_117, %c0_118], %435 {strides = array<i32>} : memref<10x8x128xf32, #tpu.memory_space<vmem>>, vector<1x8x64xf32>,
    %436 = vector.extract_strided_slice %430 {offsets = [0, 64], sizes = [8, 64], strides = [1, 1]} : vector<8x128xf32> to vector<8x64xf32>
    %c9_i32_119 = arith.constant 9 : i32
    %437 = arith.subi %c9_i32_119, %c9_i32_109 : i32
    %438 = arith.index_cast %437 : i32 to index
    %c0_120 = arith.constant 0 : index
    %c64_121 = arith.constant 64 : index
    %439 = vector.load %arg7[%438, %c0_120, %c64_121] : memref<10x8x128xf32, #tpu.memory_space<vmem>>, vector<1x8x64xf32>
    %440 = vector.shape_cast %439 : vector<1x8x64xf32> to vector<8x64xf32>
    %441 = vector.shape_cast %436 : vector<8x64xf32> to vector<1x8x64xf32>
    tpu.vector_store %arg7[%438, %c0_120, %c64_121], %441 {strides = array<i32>} : memref<10x8x128xf32, #tpu.memory_space<vmem>>, vector<1x8x64xf32>,
    %442 = arith.subf %429, %400 : vector<8x128xf32>
    %443 = arith.mulf %406, %442 : vector<8x128xf32>
    %444 = arith.addf %400, %443 : vector<8x128xf32>
    %c10_i32 = arith.constant 10 : i32
    %445 = arith.truncf %444 : vector<8x128xf32> to vector<8x128xbf16>
    %c0_122 = arith.constant 0 : index
    %c0_123 = arith.constant 0 : index
    %446 = vector.load %arg5[%c0_122, %c0_123] : memref<128x64xbf16, #tpu.memory_space<vmem>>, vector<128x64xbf16>
    %cst_124 = arith.constant dense<0.000000e+00> : vector<8x64xf32>
    %447 = tpu.matmul %445, %446, %cst_124 {dimension_numbers = #tpu.dot_dimension_numbers<[1], [0], [0], [1], [0, 0, 1, 1], [], []>} : vector<8x128xbf16>, vector<128x64xbf16>, vector<8x64xf32> -> vector<8x64xf32>
    %c0_125 = arith.constant 0 : index
    %c0_126 = arith.constant 0 : index
    %448 = vector.load %arg6[%c0_125, %c0_126] : memref<1x64xf32, #tpu.memory_space<vmem>>, vector<1x64xf32>
    %449 = vector.broadcast %448 : vector<1x64xf32> to vector<8x64xf32>
    %450 = arith.addf %447, %449 : vector<8x64xf32>
    %451 = math.tanh %450 : vector<8x64xf32>
    %c0_127 = arith.constant 0 : index
    %c0_128 = arith.constant 0 : index
    %452 = vector.load %arg8[%c0_127, %c0_128] : memref<8x64xf32, #tpu.memory_space<vmem>>, vector<8x64xf32>
    tpu.vector_store %arg8[%c0_127, %c0_128], %451 {strides = array<i32>} : memref<8x64xf32, #tpu.memory_space<vmem>>, vector<8x64xf32>,
    return
  }
  func.func @transform_0(%arg0: i32) -> (i32, i32, i32) {
    %c0_i32 = arith.constant 0 : i32
    %c0_i32_0 = arith.constant 0 : i32
    %c0_i32_1 = arith.constant 0 : i32
    return %c0_i32, %arg0, %c0_i32_0 : i32, i32, i32
  }
  func.func @transform_1(%arg0: i32) -> (i32, i32, i32) {
    %c0_i32 = arith.constant 0 : i32
    %c0_i32_0 = arith.constant 0 : i32
    %c0_i32_1 = arith.constant 0 : i32
    return %c0_i32, %arg0, %c0_i32_0 : i32, i32, i32
  }
  func.func @transform_2(%arg0: i32) -> (i32, i32) {
    %c0_i32 = arith.constant 0 : i32
    %c0_i32_0 = arith.constant 0 : i32
    %c0_i32_1 = arith.constant 0 : i32
    return %c0_i32, %c0_i32_0 : i32, i32
  }
  func.func @transform_3(%arg0: i32) -> (i32, i32) {
    %c0_i32 = arith.constant 0 : i32
    %c0_i32_0 = arith.constant 0 : i32
    %c0_i32_1 = arith.constant 0 : i32
    return %c0_i32, %c0_i32_0 : i32, i32
  }
  func.func @transform_4(%arg0: i32) -> (i32, i32) {
    %c0_i32 = arith.constant 0 : i32
    %c0_i32_0 = arith.constant 0 : i32
    %c0_i32_1 = arith.constant 0 : i32
    return %c0_i32, %c0_i32_0 : i32, i32
  }
  func.func @transform_5(%arg0: i32) -> (i32, i32) {
    %c0_i32 = arith.constant 0 : i32
    %c0_i32_0 = arith.constant 0 : i32
    %c0_i32_1 = arith.constant 0 : i32
    return %c0_i32, %c0_i32_0 : i32, i32
  }
  func.func @transform_6(%arg0: i32) -> (i32, i32, i32) {
    %c0_i32 = arith.constant 0 : i32
    %c0_i32_0 = arith.constant 0 : i32
    %c0_i32_1 = arith.constant 0 : i32
    return %c0_i32, %arg0, %c0_i32_0 : i32, i32, i32
  }
  func.func @transform_7(%arg0: i32) -> (i32, i32) {
    %c0_i32 = arith.constant 0 : i32
    %c0_i32_0 = arith.constant 0 : i32
    return %arg0, %c0_i32 : i32, i32
  }
}

</mosaic_0001>

<bundles_post_ra>
// kernel: encoder_forward.1
= control target key start
LH: loop header
LB: loop body
LE: loop exit
PB: predicated region body
PF: predicated region fallthrough
CT: control target
= control target key end

     0   :  { %s3900_s0 = inlined_call_operand.vmem [shape: f32[10,16,384], index: 0, kind: input, shape index: {}]   ;;  %s3901_s1 = inlined_call_operand.vmem [shape: f32[10,16,128], index: 1, kind: input, shape index: {}]   ;;  %s3902_s2 = inlined_call_operand.vmem [shape: bf16[128,384], index: 2, kind: input, shape index: {}]   ;;  %s3903_s3 = inlined_call_operand.vmem [shape: f32[1,384], index: 3, kind: input, shape index: {}]   ;;  %s3904_s4 = inlined_call_operand.vmem [shape: bf16[128,64], index: 4, kind: input, shape index: {}]   ;;  %s3905_s5 = inlined_call_operand.vmem [shape: f32[1,64], index: 5, kind: input, shape index: {}]   ;;  %s3906_s6 = inlined_call_operand.hbm [shape: f32[10,16,128], index: 6, kind: output, shape index: {0}]   ;;  %s3907_s7 = inlined_call_operand.hbm [shape: f32[16,64], index: 7, kind: output, shape index: {1}]  }
   0x1   :  { %3908 = sst [smem:[#allocation10_spill]] %s3900_s0 }
   0x2   :  { %13 = vsyncpa [#allocation5], 0 }
   0x3   :  { %15 = vsyncpa [#allocation5 + $0x1], 0 }
   0x4   :  { %16 = vsyncpa [#allocation7], 0 }
   0x5   :  { %18 = vsyncpa [#allocation7 + $0x1], 0  ;;  %s2856_s24 = smov 0   ;;  %s2858_s25 = smov 0  }
   0x6   :  { %s2860_s26 = smov 0   ;;  %s2862_s27 = smov 0  }
   0x7 LB: > { %s2052_s28 = sadd.s32 4294967295, %s2806_s27   ;;  %s2053_s29 = sadd.s32 4294967294, %s2806_s27   ;;  %s2806_s27 = sphi %s2862_s27, %s3916_s27   ;;  %s2802_s26 = sphi %s2860_s26, %s3915_s26   ;;  %s2798_s25 = sphi %s2858_s25, %s3914_s25   ;;  %s2794_s24 = sphi %s2856_s24, %s3913_s24  }
   0x8   : > { %s2879_s30 = sadd.s32 1, %s2806_s27   ;;  %s31_s8 = sadd.s32 1, %s2802_s26 }
   0x9   : > { %s28_s9 = ssub.s32 %s2806_s27, %s2879_s30  ;;  %p38_p0 = scmp.ne.s32.totalorder %s2802_s26, %s2798_s25 }
   0xa   : > { %p29_p1 = scmp.eq.s32.totalorder %s28_s9, 0  ;;  %p39_p2 = scmp.eq.s32.totalorder %s2806_s27, 0 }
   0xb   : > { %p178_p3 = scmp.eq.s32.totalorder %s2052_s28, 1  ;;  %p183_p4 = scmp.ne.s32.totalorder %s2798_s25, %s2794_s24 }
   0xc   : > { %s2892_s10 = scalar_select %p29_p1, %s2802_s26, %s31_s8  }
   0xd   : > { %p2894_p5 = por %p39_p2, %p38_p0  ;;  %p2898_p6 = por %p178_p3, %p38_p0 }
   0xe   : > { %p184_p7 = scmp.eq.s32.totalorder %s2053_s29, 1  ;;  %p2055_p9 = scmp.ge.s32.totalorder %s2806_s27, 2 }
  0x10   : > { %p2902_p8 = por %p184_p7, %p183_p4  ;;  %238 = sbr.rel (%p2055_p9) target bundleno = 56 (0x38), region = 32 }
  0x17   : > { %241 = sbr.rel (!%p2894_p5) target bundleno = 47 (0x2f), region = 36  ;;  %s243_s14 = sand.u32 (%p2894_p5), 1, %s2802_s26  }
  0x18   : > { %s2492_s15 = smul.u32 (%p2894_p5), 24, %s2806_s27  ;;  %s3912_s0 = sld [smem:[#allocation10_spill]] (%p2894_p5) }
  0x19   : > { %s2491_s16 = smul.u32 (%p2894_p5), 240, %s243_s14 }
  0x1b   : > { %s2921_s20 = scalar_lea.vmem (%p2894_p5), [#allocation2], %s2491_s16 }
  0x1e   : > { %s2916_s19 = scalar_lea.vmem %s3912_s0, %s2492_s15 }
  0x1f   : > { %v261_v0 = vld [vmem:[%s2916_s19] sm:$0xff]  ;;  %v263_v1 = vld [vmem:[%s2916_s19 + $0x8] sm:$0xff]  ;;  %v265_v2 = vld [vmem:[%s2916_s19 + $0x10] sm:$0xff] }
  0x20   : > { %262 = vst [vmem:[%s2921_s20] sm:$0xff] %v261_v0  ;;  %264 = vst [vmem:[%s2921_s20 + $0x8] sm:$0xff] %v263_v1  ;;  %v267_v3 = vld [vmem:[%s2916_s19 + $0x30] sm:$0xff]  ;;  %v269_v4 = vld [vmem:[%s2916_s19 + $0x38] sm:$0xff] }
  0x21   : > { %266 = vst [vmem:[%s2921_s20 + $0x10] sm:$0xff] %v265_v2  ;;  %v271_v5 = vld [vmem:[%s2916_s19 + $0x40] sm:$0xff]  ;;  %268 = vst [vmem:[%s2921_s20 + $0x18] sm:$0xff] %v267_v3  ;;  %v275_v7 = vld [vmem:[%s2916_s19 + $0x68] sm:$0xff] }
  0x22   : > { %270 = vst [vmem:[%s2921_s20 + $0x20] sm:$0xff] %v269_v4  ;;  %272 = vst [vmem:[%s2921_s20 + $0x28] sm:$0xff] %v271_v5  ;;  %v273_v6 = vld [vmem:[%s2916_s19 + $0x60] sm:$0xff]  ;;  %v277_v8 = vld [vmem:[%s2916_s19 + $0x70] sm:$0xff] }
  0x23   : > { %274 = vst [vmem:[%s2921_s20 + $0x30] sm:$0xff] %v273_v6  ;;  %276 = vst [vmem:[%s2921_s20 + $0x38] sm:$0xff] %v275_v7  ;;  %v279_v9 = vld [vmem:[%s2916_s19 + $0x90] sm:$0xff]  ;;  %v281_v10 = vld [vmem:[%s2916_s19 + $0x98] sm:$0xff] }
  0x24   : > { %278 = vst [vmem:[%s2921_s20 + $0x40] sm:$0xff] %v277_v8  ;;  %v283_v11 = vld [vmem:[%s2916_s19 + $0xa0] sm:$0xff]  ;;  %280 = vst [vmem:[%s2921_s20 + $0x48] sm:$0xff] %v279_v9  ;;  %v287_v13 = vld [vmem:[%s2916_s19 + $0xc8] sm:$0xff] }
  0x25   : > { %282 = vst [vmem:[%s2921_s20 + $0x50] sm:$0xff] %v281_v10  ;;  %284 = vst [vmem:[%s2921_s20 + $0x58] sm:$0xff] %v283_v11  ;;  %v285_v12 = vld [vmem:[%s2916_s19 + $0xc0] sm:$0xff]  ;;  %v289_v14 = vld [vmem:[%s2916_s19 + $0xd0] sm:$0xff] }
  0x26   : > { %286 = vst [vmem:[%s2921_s20 + $0x60] sm:$0xff] %v285_v12  ;;  %288 = vst [vmem:[%s2921_s20 + $0x68] sm:$0xff] %v287_v13  ;;  %v291_v15 = vld [vmem:[%s2916_s19 + $0xf0] sm:$0xff]  ;;  %v293_v16 = vld [vmem:[%s2916_s19 + $0xf8] sm:$0xff] }
  0x27   : > { %290 = vst [vmem:[%s2921_s20 + $0x70] sm:$0xff] %v289_v14  ;;  %v295_v17 = vld [vmem:[%s2916_s19 + $0x100] sm:$0xff]  ;;  %292 = vst [vmem:[%s2921_s20 + $0x78] sm:$0xff] %v291_v15  ;;  %v299_v19 = vld [vmem:[%s2916_s19 + $0x128] sm:$0xff] }
  0x28   : > { %294 = vst [vmem:[%s2921_s20 + $0x80] sm:$0xff] %v293_v16  ;;  %296 = vst [vmem:[%s2921_s20 + $0x88] sm:$0xff] %v295_v17  ;;  %v297_v18 = vld [vmem:[%s2916_s19 + $0x120] sm:$0xff]  ;;  %v301_v20 = vld [vmem:[%s2916_s19 + $0x130] sm:$0xff] }
  0x29   : > { %298 = vst [vmem:[%s2921_s20 + $0x90] sm:$0xff] %v297_v18  ;;  %300 = vst [vmem:[%s2921_s20 + $0x98] sm:$0xff] %v299_v19  ;;  %v303_v21 = vld [vmem:[%s2916_s19 + $0x150] sm:$0xff]  ;;  %v305_v22 = vld [vmem:[%s2916_s19 + $0x158] sm:$0xff] }
  0x2a   : > { %302 = vst [vmem:[%s2921_s20 + $0xa0] sm:$0xff] %v301_v20  ;;  %v307_v23 = vld [vmem:[%s2916_s19 + $0x160] sm:$0xff]  ;;  %304 = vst [vmem:[%s2921_s20 + $0xa8] sm:$0xff] %v303_v21  ;;  %v311_v25 = vld [vmem:[%s2916_s19 + $0x188] sm:$0xff] }
  0x2b   : > { %306 = vst [vmem:[%s2921_s20 + $0xb0] sm:$0xff] %v305_v22  ;;  %308 = vst [vmem:[%s2921_s20 + $0xb8] sm:$0xff] %v307_v23  ;;  %v309_v24 = vld [vmem:[%s2916_s19 + $0x180] sm:$0xff]  ;;  %v313_v26 = vld [vmem:[%s2916_s19 + $0x190] sm:$0xff] }
  0x2c   : > { %310 = vst [vmem:[%s2921_s20 + $0xc0] sm:$0xff] %v309_v24  ;;  %312 = vst [vmem:[%s2921_s20 + $0xc8] sm:$0xff] %v311_v25  ;;  %v315_v27 = vld [vmem:[%s2916_s19 + $0x1b0] sm:$0xff]  ;;  %v317_v28 = vld [vmem:[%s2916_s19 + $0x1b8] sm:$0xff] }
  0x2d   : > { %314 = vst [vmem:[%s2921_s20 + $0xd0] sm:$0xff] %v313_v26  ;;  %v319_v29 = vld [vmem:[%s2916_s19 + $0x1c0] sm:$0xff]  ;;  %316 = vst [vmem:[%s2921_s20 + $0xd8] sm:$0xff] %v315_v27 }
  0x2e   : > { %318 = vst [vmem:[%s2921_s20 + $0xe0] sm:$0xff] %v317_v28  ;;  %320 = vst [vmem:[%s2921_s20 + $0xe8] sm:$0xff] %v319_v29 }
  0x2f PF: > { %326 = sbr.rel (!%p2894_p5) target bundleno = 56 (0x38), region = 59  ;;  %s328_s21 = sand.u32 (%p2894_p5), 1, %s2802_s26  }
  0x30   : > { %s2057_s22 = sshll.u32 (%p2894_p5), %s2806_s27, 3  ;;  %s2493_s23 = smul.u32 (%p2894_p5), 80, %s328_s21 }
  0x31   : > { %s332_s9 = scalar_lea.vmem (%p2894_p5), %s3901_s1, %s2057_s22 }
  0x32   : > { %v378_v30 = vld [vmem:[%s332_s9] sm:$0xff] (%p2894_p5)  ;;  %v380_v31 = vld [vmem:[%s332_s9 + $0x10] sm:$0xff] (%p2894_p5)  ;;  %s330_s14 = scalar_lea.vmem (%p2894_p5), [#allocation3], %s2493_s23 }
  0x33   : > { %v382_v32 = vld [vmem:[%s332_s9 + $0x20] sm:$0xff] (%p2894_p5)  ;;  %v384_v33 = vld [vmem:[%s332_s9 + $0x30] sm:$0xff] (%p2894_p5)  ;;  %379 = vst [vmem:[%s330_s14] sm:$0xff] (%p2894_p5), %v378_v30  ;;  %381 = vst [vmem:[%s330_s14 + $0x8] sm:$0xff] (%p2894_p5), %v380_v31 }
  0x34   : > { %v386_v34 = vld [vmem:[%s332_s9 + $0x40] sm:$0xff] (%p2894_p5)  ;;  %v388_v35 = vld [vmem:[%s332_s9 + $0x50] sm:$0xff] (%p2894_p5)  ;;  %383 = vst [vmem:[%s330_s14 + $0x10] sm:$0xff] (%p2894_p5), %v382_v32  ;;  %385 = vst [vmem:[%s330_s14 + $0x18] sm:$0xff] (%p2894_p5), %v384_v33 }
  0x35   : > { %387 = vst [vmem:[%s330_s14 + $0x20] sm:$0xff] (%p2894_p5), %v386_v34  ;;  %389 = vst [vmem:[%s330_s14 + $0x28] sm:$0xff] (%p2894_p5), %v388_v35  ;;  %v390_v36 = vld [vmem:[%s332_s9 + $0x60] sm:$0xff] (%p2894_p5)  ;;  %v392_v37 = vld [vmem:[%s332_s9 + $0x70] sm:$0xff] (%p2894_p5) }
  0x36   : > { %v394_v38 = vld [vmem:[%s332_s9 + $0x80] sm:$0xff]  ;;  %391 = vst [vmem:[%s330_s14 + $0x30] sm:$0xff] %v390_v36  ;;  %393 = vst [vmem:[%s330_s14 + $0x38] sm:$0xff] %v392_v37  ;;  %v396_v39 = vld [vmem:[%s332_s9 + $0x90] sm:$0xff] }
  0x37   : > { %395 = vst [vmem:[%s330_s14 + $0x40] sm:$0xff] %v394_v38  ;;  %397 = vst [vmem:[%s330_s14 + $0x48] sm:$0xff] %v396_v39 }
  0x38 PF: > { %p2058_p10 = scmp.ge.s32.totalorder %s2806_s27, 1  ;;  %p402_p11 = scmp.lt.s32.totalorder %s2806_s27, 3 }
  0x3a   : > { %p403_p12 = pnand %p2058_p10, %p402_p11 }
  0x3b   : > { %v2992_v40 = vld [vmem:[%s3902_s2 + $0x4] ss:$12 sps:$4 sm:$0xff] (!%p403_p12)   ;;  %v2997_v41 = vld [vmem:[%s3902_s2] ss:$12 sps:$4 sm:$0xff] (!%p403_p12)   ;;  %v2808_v42 = vmov (!%p403_p12), 0.0   ;;  %v2809_v43 = vmov (!%p403_p12), 0   ;;  %v491_v2 = vlaneseq (!%p403_p12) }
  0x3c   : > { %406 = sbr.rel (%p403_p12) target bundleno = 3018 (0xbca), region = 97  ;;  %2271 = vmatprep.subr.bf16.mxu1 (!%p403_p12), %v2808_v42  ;;  %670 = vmatprep.mubr.bf16.mxu0 (!%p403_p12), %v2809_v43  ;;  %v3005_v44 = vld [vmem:[%s3902_s2 + $0x1c] ss:$12 sps:$4 sm:$0xff] (!%p403_p12)   ;;  %vm2810_vm0 = vmmov (!%p403_p12), 0   ;;  %v3013_v45 = vld [vmem:[%s3902_s2 + $0x18] ss:$12 sps:$4 sm:$0xff] (!%p403_p12)  }
  0x3d   : > { %638 = vmatprep.subr.bf16.mxu0 (!%p403_p12), %v2992_v40  ;;  %2287 = vmatprep.mubr.msk.bf16.mxu1 (!%p403_p12), %vm2810_vm0, %v2808_v42  ;;  %v3019_v46 = vld [vmem:[%s3902_s2 + $0x34] ss:$12 sps:$4 sm:$0xff] (!%p403_p12)   ;;  %v3025_v47 = vld [vmem:[%s3902_s2 + $0x30] ss:$12 sps:$4 sm:$0xff] (!%p403_p12)   ;;  %v3031_v48 = vld [vmem:[%s3902_s2 + $0x4c] ss:$12 sps:$4 sm:$0xff] (!%p403_p12)  }
  0x3e   : > { %639 = vmatpush1.bf16.msra.mxu0 (!%p403_p12), %v2997_v41  ;;  %v3036_v49 = vld [vmem:[%s3902_s2 + $0x8] ss:$12 sps:$4 sm:$0xff] (!%p403_p12)   ;;  %v3047_v51 = vld [vmem:[%s3902_s2 + $0x64] ss:$12 sps:$4 sm:$0xff] (!%p403_p12)   ;;  %v3054_v52 = vld [vmem:[%s3902_s2 + $0x20] ss:$12 sps:$4 sm:$0xff] (!%p403_p12)  }
  0x3f   : > { %640 = vmatprep.subr.bf16.mxu0 (!%p403_p12), %v3005_v44  ;;  %v3042_v50 = vld [vmem:[%s3902_s2 + $0x48] ss:$12 sps:$4 sm:$0xff] (!%p403_p12)   ;;  %2272 = vmatpush3.bf16.msra.mxu1 (!%p403_p12), %v3036_v49  ;;  %v3060_v53 = vld [vmem:[%s3902_s2 + $0x60] ss:$12 sps:$4 sm:$0xff] (!%p403_p12)   ;;  %v3073_v55 = vld [vmem:[%s3902_s2 + $0x38] ss:$12 sps:$4 sm:$0xff] (!%p403_p12)  }
  0x40   : > { %2273 = vmatprep.subr.bf16.mxu1 (!%p403_p12), %v2808_v42  ;;  %v3066_v54 = vld [vmem:[%s3902_s2 + $0x7c] ss:$12 sps:$4 sm:$0xff] (!%p403_p12)   ;;  %v3079_v56 = vld [vmem:[%s3902_s2 + $0x78] ss:$12 sps:$4 sm:$0xff] (!%p403_p12)   ;;  %v3084_v57 = vld [vmem:[%s3902_s2 + $0x94] ss:$12 sps:$4 sm:$0xff] (!%p403_p12)  }
  0x41   : > { %v3090_v58 = vld [vmem:[%s3902_s2 + $0x50] ss:$12 sps:$4 sm:$0xff] (!%p403_p12)   ;;  %v3103_v60 = vld [vmem:[%s3902_s2 + $0xac] ss:$12 sps:$4 sm:$0xff] (!%p403_p12)   ;;  %v3111_v61 = vld [vmem:[%s3902_s2 + $0x68] ss:$12 sps:$4 sm:$0xff] (!%p403_p12)  }
  0x42   : > { %641 = vmatpush1.bf16.msra.mxu0 (!%p403_p12), %v3013_v45  ;;  %v3097_v59 = vld [vmem:[%s3902_s2 + $0x90] ss:$12 sps:$4 sm:$0xff] (!%p403_p12)   ;;  %v3118_v62 = vld [vmem:[%s3902_s2 + $0xa8] ss:$12 sps:$4 sm:$0xff] (!%p403_p12)   ;;  %v3125_v63 = vld [vmem:[%s3902_s2 + $0x80] ss:$12 sps:$4 sm:$0xff] (!%p403_p12)  }
  0x43   : > { %642 = vmatprep.subr.bf16.mxu0 %v3019_v46  ;;  %2274 = vmatpush3.bf16.msra.mxu1 %v3054_v52  ;;  %v3133_v0 = vld [vmem:[%s3902_s2 + $0x98] ss:$12 sps:$4 sm:$0xff]   ;;  %v3144_v1 = vld [vmem:[%s3902_s2 + $0xb0] ss:$12 sps:$4 sm:$0xff]   ;;  %v492_v3 = vshrl.u32 %v491_v2, 7  ;;  %s3184_s20 = sand.u32 1, %s2798_s25  }
  0x44   : > { %2275 = vmatprep.subr.bf16.mxu1 %v2808_v42  ;;  %s2494_s21 = smul.u32 240, %s3184_s20  ;;  %v489_v5 = vld [vmem:[%s3903_s3] sm:$0x7]  ;;  %vm741_vm1 = vcmask 523264   ;;  %vm744_vm2 = vcmask 1048064   ;;  %s1905_s22 = scalar_lea.sflag [#allocation5], %s3184_s20 }
  0x45   : > { %v493_v4 = vsub.s32 0, %v492_v3  ;;  %v497_v6 = vsub.s32 1, %v492_v3  ;;  %v501_v27 = vsub.s32 2, %v492_v3  ;;  %s2495_s8 = smul.u32 80, %s3184_s20 }
  0x46   : > { %643 = vmatpush1.bf16.msra.mxu0 %v3025_v47  ;;  %s3194_s29 = scalar_lea.vmem [#allocation2], %s2494_s21 }
  0x47   : > { %644 = vmatprep.subr.bf16.mxu0 %v3031_v48  ;;  %2276 = vmatpush3.bf16.msra.mxu1 %v3073_v55  ;;  %v3190_v7 = vrot.slane %v489_v5, %v493_v4  ;;  %v3192_v8 = vrot.slane %v489_v5, %v497_v6  ;;  %v506_v9 = vld [vmem:[%s3194_s29] sm:$0xff]  ;;  %v507_v16 = vld [vmem:[%s3194_s29 + $0x8] sm:$0xff]  ;;  %v3200_v28 = vrot.slane %v489_v5, %v501_v27  ;;  %v508_v33 = vld [vmem:[%s3194_s29 + $0x10] sm:$0xff]  ;;  %s3205_s9 = scalar_lea.vmem [#allocation3], %s2495_s8  ;;  %s3212_s14 = scalar_lea.vmem [#allocation4], %s2495_s8 }
  0x48   : > { %2277 = vmatprep.subr.bf16.mxu1 %v2808_v42  ;;  %v509_v3 = vld [vmem:[%s3205_s9] sm:$0xff]  ;;  %s1922_s18 = sshll.u32 %s3212_s14, 4  ;;  %s3821_s18 = int_to_ptr.vmem [resolvable:$true] %s1922_s18 }
  0x49   : > { %s2712_s23 = scalar_lea.vmem %s3821_s18, 1280 }
  0x4a   : > { %645 = vmatpush1.bf16.msra.mxu0 %v3042_v50  ;;  %p2713_p13 = scmp.ne.s32.totalorder %s3821_s18, %s2712_s23 }
  0x4b   : > { %646 = vmatprep.subr.bf16.mxu0 %v3047_v51  ;;  %2278 = vmatpush3.bf16.msra.mxu1 %v3090_v58 }
  0x4c   : > { %2279 = vmatprep.subr.bf16.mxu1 %v2808_v42  ;;  %p2714_p0 = pnand %p2713_p13, %p2898_p6 }
  0x4e   : > { %647 = vmatpush1.bf16.msra.mxu0 %v3060_v53  ;;  %p2715_p1 = pneg %p2714_p0 }
  0x4f   : > { %648 = vmatprep.subr.bf16.mxu0 %v3066_v54  ;;  %2280 = vmatpush3.bf16.msra.mxu1 %v3111_v61 }
  0x50   : > { %2281 = vmatprep.subr.bf16.mxu1 %v2808_v42 }
  0x52   : > { %649 = vmatpush1.bf16.msra.mxu0 %v3079_v56 }
  0x53   : > { %650 = vmatprep.subr.bf16.mxu0 %v3084_v57  ;;  %2282 = vmatpush3.bf16.msra.mxu1 %v3125_v63 }
  0x54   : > { %2283 = vmatprep.subr.bf16.mxu1 %v2808_v42 }
  0x56   : > { %651 = vmatpush1.bf16.msra.mxu0 %v3097_v59 }
  0x57   : > { %652 = vmatprep.subr.bf16.mxu0 %v3103_v60  ;;  %2284 = vmatpush3.bf16.msra.mxu1 %v3133_v0 }
  0x58   : > { %2285 = vmatprep.subr.bf16.mxu1 %v2808_v42 }
  0x5a   : > { %653 = vmatpush1.bf16.msra.mxu0 %v3118_v62 }
  0x5b   : > { %754 = vmatprep.subr.bf16.mxu0 %v2992_v40  ;;  %2286 = vmatpush3.bf16.msra.mxu1 %v3144_v1 }
  0x5c   : > { %2291 = vmatprep.subr.bf16.mxu1 %v2808_v42 }
  0x5d   : > { %671 = vmatmul.mubr.bf16.vlgmr.msra.gmra.mrb[0].mxu0 %v2809_v43 }
  0x5e   : > { %755 = vmatpush1.bf16.msra.mxu0 %v2997_v41  ;;  %786 = vmatprep.mubr.bf16.mxu0 %v2809_v43 }
  0x5f   : > { %756 = vmatprep.subr.bf16.mxu0 %v3005_v44  ;;  %2288 = vmatmul.mubr.bf16.vlgmr.msra.gmra.mrb[0].mxu1 %v2809_v43 }
  0x60   : > { %2292 = vmatpush3.bf16.msra.mxu1 %v3036_v49  ;;  %2307 = vmatprep.mubr.msk.bf16.mxu1 %vm2810_vm0, %v2808_v42 }
  0x61   : > { %2293 = vmatprep.subr.bf16.mxu1 %v2808_v42 }
  0x62   : > { %757 = vmatpush1.bf16.msra.mxu0 %v3013_v45 }
  0x63   : > { %758 = vmatprep.subr.bf16.mxu0 %v3019_v46 }
  0x64   : > { %2294 = vmatpush3.bf16.msra.mxu1 %v3054_v52 }
  0x65   : > { %2295 = vmatprep.subr.bf16.mxu1 %v2808_v42 }
  0x66   : > { %759 = vmatpush1.bf16.msra.mxu0 %v3025_v47 }
  0x67   : > { %760 = vmatprep.subr.bf16.mxu0 %v3031_v48 }
  0x68   : > { %2296 = vmatpush3.bf16.msra.mxu1 %v3073_v55 }
  0x69   : > { %2297 = vmatprep.subr.bf16.mxu1 %v2808_v42 }
  0x6a   : > { %761 = vmatpush1.bf16.msra.mxu0 %v3042_v50 }
  0x6b   : > { %762 = vmatprep.subr.bf16.mxu0 %v3047_v51 }
  0x6c   : > { %2298 = vmatpush3.bf16.msra.mxu1 %v3090_v58 }
  0x6d   : > { %2299 = vmatprep.subr.bf16.mxu1 %v2808_v42 }
  0x6e   : > { %763 = vmatpush1.bf16.msra.mxu0 %v3060_v53 }
  0x6f   : > { %764 = vmatprep.subr.bf16.mxu0 %v3066_v54 }
  0x70   : > { %2300 = vmatpush3.bf16.msra.mxu1 %v3111_v61 }
  0x71   : > { %2301 = vmatprep.subr.bf16.mxu1 %v2808_v42 }
  0x72   : > { %765 = vmatpush1.bf16.msra.mxu0 %v3079_v56 }
  0x73   : > { %766 = vmatprep.subr.bf16.mxu0 %v3084_v57 }
  0x74   : > { %2302 = vmatpush3.bf16.msra.mxu1 %v3125_v63 }
  0x75   : > { %2303 = vmatprep.subr.bf16.mxu1 %v2808_v42 }
  0x76   : > { %767 = vmatpush1.bf16.msra.mxu0 %v3097_v59 }
  0x77   : > { %768 = vmatprep.subr.bf16.mxu0 %v3103_v60 }
  0x78   : > { %2304 = vmatpush3.bf16.msra.mxu1 %v3133_v0 }
  0x79   : > { %2305 = vmatprep.subr.bf16.mxu1 %v2808_v42 }
  0x7a   : > { %769 = vmatpush1.bf16.msra.mxu0 %v3118_v62 }
  0x7b   : > { %871 = vmatprep.subr.bf16.mxu0 %v2992_v40 }
  0x7c   : > { %2306 = vmatpush3.bf16.msra.mxu1 %v3144_v1 }
  0x7d   : > { %2311 = vmatprep.subr.bf16.mxu1 %v2808_v42 }
 0x130   : > { %v672_v10 = vpop.f32.mrb[0].mxu0 }
 0x131   : > { %v673_v11 = vadd.f32 %v672_v10, %v3190_v7  ;;  %v674_v12 = vpop.f32.mrb[1].mxu0 }
 0x132   : > { %v675_v13 = vadd.f32 %v674_v12, %v3192_v8  ;;  %v676_v14 = vpop.f32.mrb[2].mxu0  ;;  %v713_v20 = vpop.f32.mrb[0].mxu1 }
 0x133   : > { %v719_v15 = vadd.f32 %v673_v11, %v506_v9  ;;  %v677_v17 = vpop.f32.mrb[3].mxu0  ;;  %v2289_v22 = vpop.f32.mrb[1].mxu1  ;;  %v714_v31 = vadd.f32 %v713_v20, %v3200_v28  ;;  %v2087_v9 = vld [vmem:[%s3194_s29 + $0x18] sm:$0xff] }
 0x134   : > { %v720_v19 = vadd.f32 %v675_v13, %v507_v16  ;;  %v716_v23 = vpop.f32.mrb[2].mxu1 }
 0x135   : > { %v2084_v18 = vmul.f32 -1.442695, %v719_v15  ;;  %v2290_v24 = vpop.f32.mrb[3].mxu1 }
 0x136   : > { %v2085_v21 = vmul.f32 -1.442695, %v720_v19  ;;  %v2088_v19 = vld [vmem:[%s3194_s29 + $0x20] sm:$0xff] }
 0x137   : > { %2586 = vpow2.f32 %v2084_v18 }
 0x138   : > { %2588 = vpow2.f32 %v2085_v21 }
 0x141   : > { %v2587_v25 = vpop.eup %2586 }
 0x142   : > { %v727_v26 = vadd.f32 1.0, %v2587_v25  ;;  %v2589_v29 = vpop.eup %2588 }
 0x143   : > { %v728_v30 = vadd.f32 1.0, %v2589_v29 }
 0x144   : > { %2590 = vrcp.f32 %v727_v26 }
 0x145   : > { %2592 = vrcp.f32 %v728_v30 }
 0x14e   : > { %v2591_v32 = vpop.eup %2590 }
 0x14f   : > { %v733_v34 = vmul.f32 %v2591_v32, %v714_v31  ;;  %v2593_v36 = vpop.eup %2592  ;;  %v2089_v32 = vld [vmem:[%s3194_s29 + $0x28] sm:$0xff] }
 0x150   : > { %v736_v37 = vsub.f32 1.0, %v2593_v36  ;;  %v738_v39 = vmul.f32 0.0, %v2593_v36 }
 0x151   : > { %v734_v35 = vadd.f32 %v733_v34, %v508_v33 }
 0x153   : > { %2594 = vtanh.f32 %v734_v35 }
 0x15d   : > { %v2595_v38 = vpop.eup %2594 }
 0x15e   : > { %v737_v2 = vmul.f32 %v2595_v38, %v736_v37 }
 0x160   : > { %v739_v4 = vadd.f32 %v738_v39, %v737_v2  ;;  %v2090_v2 = vld [vmem:[%s3205_s9 + $0x8] sm:$0xff] }
 0x162   : > { %v3208_v5 = vmul.f32 %v739_v4, %v509_v3 }
 0x164   : > { %v753_v6 = vpack.c.bf16 %v3208_v5, %v3208_v5  ;;  %742 = vst.msk [vmem:[%s3212_s14] sm:$0xff] %vm741_vm1, %v3208_v5 }
 0x165   : > { %2086 = vst.msk [vmem:[%s3212_s14 + $0x48] sm:$0xff] %vm744_vm2, %v3208_v5 }
 0x166   : > { %787 = vmatmul.mubr.bf16.vlgmr.msra.gmra.mrb[4].mxu0 %v753_v6  ;;  %2308 = vmatmul.mubr.bf16.vlgmr.msra.gmra.mrb[4].mxu1 %v753_v6 }
 0x167   : > { %872 = vmatpush1.bf16.msra.mxu0 %v2997_v41  ;;  %2312 = vmatpush3.bf16.msra.mxu1 %v3036_v49 }
 0x168   : > { %873 = vmatprep.subr.bf16.mxu0 %v3005_v44  ;;  %2313 = vmatprep.subr.bf16.mxu1 %v2808_v42 }
 0x169   : > { %903 = vmatprep.mubr.bf16.mxu0 %v2809_v43  ;;  %2327 = vmatprep.mubr.msk.bf16.mxu1 %vm2810_vm0, %v2808_v42 }
 0x16b   : > { %874 = vmatpush1.bf16.msra.mxu0 %v3013_v45  ;;  %2314 = vmatpush3.bf16.msra.mxu1 %v3054_v52 }
 0x16c   : > { %875 = vmatprep.subr.bf16.mxu0 %v3019_v46  ;;  %2315 = vmatprep.subr.bf16.mxu1 %v2808_v42 }
 0x16f   : > { %876 = vmatpush1.bf16.msra.mxu0 %v3025_v47  ;;  %2316 = vmatpush3.bf16.msra.mxu1 %v3073_v55 }
 0x170   : > { %877 = vmatprep.subr.bf16.mxu0 %v3031_v48  ;;  %2317 = vmatprep.subr.bf16.mxu1 %v2808_v42 }
 0x173   : > { %878 = vmatpush1.bf16.msra.mxu0 %v3042_v50  ;;  %2318 = vmatpush3.bf16.msra.mxu1 %v3090_v58 }
 0x174   : > { %879 = vmatprep.subr.bf16.mxu0 %v3047_v51  ;;  %2319 = vmatprep.subr.bf16.mxu1 %v2808_v42 }
 0x177   : > { %880 = vmatpush1.bf16.msra.mxu0 %v3060_v53  ;;  %2320 = vmatpush3.bf16.msra.mxu1 %v3111_v61 }
 0x178   : > { %881 = vmatprep.subr.bf16.mxu0 %v3066_v54  ;;  %2321 = vmatprep.subr.bf16.mxu1 %v2808_v42 }
 0x17b   : > { %882 = vmatpush1.bf16.msra.mxu0 %v3079_v56  ;;  %2322 = vmatpush3.bf16.msra.mxu1 %v3125_v63 }
 0x17c   : > { %883 = vmatprep.subr.bf16.mxu0 %v3084_v57  ;;  %2323 = vmatprep.subr.bf16.mxu1 %v2808_v42 }
 0x17f   : > { %884 = vmatpush1.bf16.msra.mxu0 %v3097_v59  ;;  %2324 = vmatpush3.bf16.msra.mxu1 %v3133_v0 }
 0x180   : > { %885 = vmatprep.subr.bf16.mxu0 %v3103_v60  ;;  %2325 = vmatprep.subr.bf16.mxu1 %v2808_v42 }
 0x183   : > { %886 = vmatpush1.bf16.msra.mxu0 %v3118_v62  ;;  %2326 = vmatpush3.bf16.msra.mxu1 %v3144_v1 }
 0x184   : > { %988 = vmatprep.subr.bf16.mxu0 %v2992_v40  ;;  %2331 = vmatprep.subr.bf16.mxu1 %v2808_v42 }
 0x239   : > { %v788_v10 = vpop.f32.mrb[4].mxu0  ;;  %v829_v11 = vpop.f32.mrb[4].mxu1 }
 0x23a   : > { %v789_v12 = vadd.f32 %v788_v10, %v3190_v7  ;;  %v790_v13 = vpop.f32.mrb[5].mxu0  ;;  %v2309_v14 = vpop.f32.mrb[5].mxu1  ;;  %v830_v30 = vadd.f32 %v829_v11, %v3200_v28 }
 0x23b   : > { %v791_v15 = vadd.f32 %v790_v13, %v3192_v8  ;;  %v792_v16 = vpop.f32.mrb[6].mxu0  ;;  %v832_v17 = vpop.f32.mrb[6].mxu1 }
 0x23c   : > { %v835_v18 = vadd.f32 %v2087_v9, %v789_v12  ;;  %v793_v20 = vpop.f32.mrb[7].mxu0  ;;  %v2310_v21 = vpop.f32.mrb[7].mxu1 }
 0x23d   : > { %v836_v23 = vadd.f32 %v2088_v19, %v791_v15  ;;  %v2096_v21 = vld [vmem:[%s3194_s29 + $0x38] sm:$0xff] }
 0x23e   : > { %v2091_v22 = vmul.f32 -1.442695, %v835_v18 }
 0x23f   : > { %v2092_v24 = vmul.f32 -1.442695, %v836_v23 }
 0x240   : > { %2596 = vpow2.f32 %v2091_v22 }
 0x241   : > { %2598 = vpow2.f32 %v2092_v24 }
 0x24a   : > { %v2597_v25 = vpop.eup %2596 }
 0x24b   : > { %v843_v26 = vadd.f32 1.0, %v2597_v25  ;;  %v2599_v27 = vpop.eup %2598 }
 0x24c   : > { %v844_v29 = vadd.f32 1.0, %v2599_v27 }
 0x24d   : > { %2600 = vrcp.f32 %v843_v26 }
 0x24e   : > { %2602 = vrcp.f32 %v844_v29 }
 0x257   : > { %v2601_v31 = vpop.eup %2600 }
 0x258   : > { %v849_v33 = vmul.f32 %v2601_v31, %v830_v30  ;;  %v2603_v35 = vpop.eup %2602 }
 0x259   : > { %v852_v36 = vsub.f32 1.0, %v2603_v35  ;;  %v854_v39 = vmul.f32 %v2603_v35, %v3208_v5 }
 0x25a   : > { %v850_v34 = vadd.f32 %v2089_v32, %v849_v33 }
 0x25c   : > { %2604 = vtanh.f32 %v850_v34  ;;  %v2097_v34 = vld [vmem:[%s3194_s29 + $0x40] sm:$0xff] }
 0x266   : > { %v2605_v37 = vpop.eup %2604 }
 0x267   : > { %v853_v38 = vmul.f32 %v2605_v37, %v852_v36 }
 0x269   : > { %v855_v3 = vadd.f32 %v854_v39, %v853_v38 }
 0x26b   : > { %v856_v4 = vmul.f32 %v2090_v2, %v855_v3  ;;  %v861_v6 = vsub.f32 %v855_v3, %v3208_v5 }
 0x26d   : > { %2093 = vst.msk [vmem:[%s3212_s14 + $0x8] sm:$0xff] %vm741_vm1, %v856_v4  ;;  %v862_v9 = vmul.f32 %v2090_v2, %v861_v6 }
 0x26e   : > { %2094 = vst.msk [vmem:[%s3212_s14 + $0x40] sm:$0xff] %vm744_vm2, %v856_v4  ;;  %v2098_v4 = vld [vmem:[%s3205_s9 + $0x10] sm:$0xff] }
 0x26f   : > { %v3269_v10 = vadd.f32 %v862_v9, %v3208_v5  ;;  %v2095_v5 = vld [vmem:[%s3194_s29 + $0x30] sm:$0xff] }
 0x271   : > { %v870_v11 = vpack.c.bf16 %v3269_v10, %v3269_v10 }
 0x273   : > { %904 = vmatmul.mubr.bf16.vlgmr.msra.gmra.mrb[8].mxu0 %v870_v11  ;;  %2328 = vmatmul.mubr.bf16.vlgmr.msra.gmra.mrb[8].mxu1 %v870_v11 }
 0x274   : > { %989 = vmatpush1.bf16.msra.mxu0 %v2997_v41  ;;  %2332 = vmatpush3.bf16.msra.mxu1 %v3036_v49 }
 0x275   : > { %990 = vmatprep.subr.bf16.mxu0 %v3005_v44  ;;  %2333 = vmatprep.subr.bf16.mxu1 %v2808_v42 }
 0x276   : > { %1020 = vmatprep.mubr.bf16.mxu0 %v2809_v43  ;;  %2347 = vmatprep.mubr.msk.bf16.mxu1 %vm2810_vm0, %v2808_v42 }
 0x278   : > { %991 = vmatpush1.bf16.msra.mxu0 %v3013_v45  ;;  %2334 = vmatpush3.bf16.msra.mxu1 %v3054_v52 }
 0x279   : > { %992 = vmatprep.subr.bf16.mxu0 %v3019_v46  ;;  %2335 = vmatprep.subr.bf16.mxu1 %v2808_v42 }
 0x27c   : > { %993 = vmatpush1.bf16.msra.mxu0 %v3025_v47  ;;  %2336 = vmatpush3.bf16.msra.mxu1 %v3073_v55 }
 0x27d   : > { %994 = vmatprep.subr.bf16.mxu0 %v3031_v48  ;;  %2337 = vmatprep.subr.bf16.mxu1 %v2808_v42 }
 0x280   : > { %995 = vmatpush1.bf16.msra.mxu0 %v3042_v50  ;;  %2338 = vmatpush3.bf16.msra.mxu1 %v3090_v58 }
 0x281   : > { %996 = vmatprep.subr.bf16.mxu0 %v3047_v51  ;;  %2339 = vmatprep.subr.bf16.mxu1 %v2808_v42 }
 0x284   : > { %997 = vmatpush1.bf16.msra.mxu0 %v3060_v53  ;;  %2340 = vmatpush3.bf16.msra.mxu1 %v3111_v61 }
 0x285   : > { %998 = vmatprep.subr.bf16.mxu0 %v3066_v54  ;;  %2341 = vmatprep.subr.bf16.mxu1 %v2808_v42 }
 0x288   : > { %999 = vmatpush1.bf16.msra.mxu0 %v3079_v56  ;;  %2342 = vmatpush3.bf16.msra.mxu1 %v3125_v63 }
 0x289   : > { %1000 = vmatprep.subr.bf16.mxu0 %v3084_v57  ;;  %2343 = vmatprep.subr.bf16.mxu1 %v2808_v42 }
 0x28c   : > { %1001 = vmatpush1.bf16.msra.mxu0 %v3097_v59  ;;  %2344 = vmatpush3.bf16.msra.mxu1 %v3133_v0 }
 0x28d   : > { %1002 = vmatprep.subr.bf16.mxu0 %v3103_v60  ;;  %2345 = vmatprep.subr.bf16.mxu1 %v2808_v42 }
 0x290   : > { %1003 = vmatpush1.bf16.msra.mxu0 %v3118_v62  ;;  %2346 = vmatpush3.bf16.msra.mxu1 %v3144_v1 }
 0x291   : > { %1105 = vmatprep.subr.bf16.mxu0 %v2992_v40  ;;  %2351 = vmatprep.subr.bf16.mxu1 %v2808_v42 }
 0x346   : > { %v905_v12 = vpop.f32.mrb[8].mxu0  ;;  %v946_v13 = vpop.f32.mrb[8].mxu1 }
 0x347   : > { %v906_v14 = vadd.f32 %v905_v12, %v3190_v7  ;;  %v907_v15 = vpop.f32.mrb[9].mxu0  ;;  %v2329_v16 = vpop.f32.mrb[9].mxu1  ;;  %v947_v32 = vadd.f32 %v946_v13, %v3200_v28 }
 0x348   : > { %v908_v17 = vadd.f32 %v907_v15, %v3192_v8  ;;  %v909_v18 = vpop.f32.mrb[10].mxu0  ;;  %v949_v19 = vpop.f32.mrb[10].mxu1 }
 0x349   : > { %v952_v20 = vadd.f32 %v2095_v5, %v906_v14  ;;  %v910_v22 = vpop.f32.mrb[11].mxu0  ;;  %v2330_v23 = vpop.f32.mrb[11].mxu1 }
 0x34a   : > { %v953_v25 = vadd.f32 %v2096_v21, %v908_v17  ;;  %v2104_v23 = vld [vmem:[%s3194_s29 + $0x50] sm:$0xff] }
 0x34b   : > { %v2099_v24 = vmul.f32 -1.442695, %v952_v20 }
 0x34c   : > { %v2100_v26 = vmul.f32 -1.442695, %v953_v25 }
 0x34d   : > { %2606 = vpow2.f32 %v2099_v24 }
 0x34e   : > { %2608 = vpow2.f32 %v2100_v26 }
 0x357   : > { %v2607_v27 = vpop.eup %2606 }
 0x358   : > { %v960_v29 = vadd.f32 1.0, %v2607_v27  ;;  %v2609_v30 = vpop.eup %2608 }
 0x359   : > { %v961_v31 = vadd.f32 1.0, %v2609_v30 }
 0x35a   : > { %2610 = vrcp.f32 %v960_v29 }
 0x35b   : > { %2612 = vrcp.f32 %v961_v31 }
 0x364   : > { %v2611_v33 = vpop.eup %2610 }
 0x365   : > { %v966_v35 = vmul.f32 %v2611_v33, %v947_v32  ;;  %v2613_v37 = vpop.eup %2612 }
 0x366   : > { %v969_v38 = vsub.f32 1.0, %v2613_v37  ;;  %v971_v3 = vmul.f32 %v2613_v37, %v3269_v10 }
 0x367   : > { %v967_v36 = vadd.f32 %v2097_v34, %v966_v35 }
 0x369   : > { %2614 = vtanh.f32 %v967_v36  ;;  %v2105_v36 = vld [vmem:[%s3194_s29 + $0x58] sm:$0xff] }
 0x373   : > { %v2615_v39 = vpop.eup %2614 }
 0x374   : > { %v970_v2 = vmul.f32 %v2615_v39, %v969_v38 }
 0x376   : > { %v972_v6 = vadd.f32 %v971_v3, %v970_v2 }
 0x378   : > { %v973_v9 = vmul.f32 %v2098_v4, %v972_v6  ;;  %v978_v11 = vsub.f32 %v972_v6, %v3269_v10 }
 0x37a   : > { %2101 = vst.msk [vmem:[%s3212_s14 + $0x10] sm:$0xff] %vm741_vm1, %v973_v9  ;;  %v979_v5 = vmul.f32 %v2098_v4, %v978_v11 }
 0x37b   : > { %2102 = vst.msk [vmem:[%s3212_s14 + $0x38] sm:$0xff] %vm744_vm2, %v973_v9  ;;  %v2106_v9 = vld [vmem:[%s3205_s9 + $0x18] sm:$0xff] }
 0x37c   : > { %v3322_v12 = vadd.f32 %v979_v5, %v3269_v10  ;;  %v2103_v10 = vld [vmem:[%s3194_s29 + $0x48] sm:$0xff] }
 0x37e   : > { %v987_v13 = vpack.c.bf16 %v3322_v12, %v3322_v12 }
 0x380   : > { %1021 = vmatmul.mubr.bf16.vlgmr.msra.gmra.mrb[12].mxu0 %v987_v13  ;;  %2348 = vmatmul.mubr.bf16.vlgmr.msra.gmra.mrb[12].mxu1 %v987_v13 }
 0x381   : > { %1106 = vmatpush1.bf16.msra.mxu0 %v2997_v41  ;;  %2352 = vmatpush3.bf16.msra.mxu1 %v3036_v49 }
 0x382   : > { %1107 = vmatprep.subr.bf16.mxu0 %v3005_v44  ;;  %2353 = vmatprep.subr.bf16.mxu1 %v2808_v42 }
 0x383   : > { %1137 = vmatprep.mubr.bf16.mxu0 %v2809_v43  ;;  %2367 = vmatprep.mubr.msk.bf16.mxu1 %vm2810_vm0, %v2808_v42 }
 0x385   : > { %1108 = vmatpush1.bf16.msra.mxu0 %v3013_v45  ;;  %2354 = vmatpush3.bf16.msra.mxu1 %v3054_v52 }
 0x386   : > { %1109 = vmatprep.subr.bf16.mxu0 %v3019_v46  ;;  %2355 = vmatprep.subr.bf16.mxu1 %v2808_v42 }
 0x389   : > { %1110 = vmatpush1.bf16.msra.mxu0 %v3025_v47  ;;  %2356 = vmatpush3.bf16.msra.mxu1 %v3073_v55 }
 0x38a   : > { %1111 = vmatprep.subr.bf16.mxu0 %v3031_v48  ;;  %2357 = vmatprep.subr.bf16.mxu1 %v2808_v42 }
 0x38d   : > { %1112 = vmatpush1.bf16.msra.mxu0 %v3042_v50  ;;  %2358 = vmatpush3.bf16.msra.mxu1 %v3090_v58 }
 0x38e   : > { %1113 = vmatprep.subr.bf16.mxu0 %v3047_v51  ;;  %2359 = vmatprep.subr.bf16.mxu1 %v2808_v42 }
 0x391   : > { %1114 = vmatpush1.bf16.msra.mxu0 %v3060_v53  ;;  %2360 = vmatpush3.bf16.msra.mxu1 %v3111_v61 }
 0x392   : > { %1115 = vmatprep.subr.bf16.mxu0 %v3066_v54  ;;  %2361 = vmatprep.subr.bf16.mxu1 %v2808_v42 }
 0x395   : > { %1116 = vmatpush1.bf16.msra.mxu0 %v3079_v56  ;;  %2362 = vmatpush3.bf16.msra.mxu1 %v3125_v63 }
 0x396   : > { %1117 = vmatprep.subr.bf16.mxu0 %v3084_v57  ;;  %2363 = vmatprep.subr.bf16.mxu1 %v2808_v42 }
 0x399   : > { %1118 = vmatpush1.bf16.msra.mxu0 %v3097_v59  ;;  %2364 = vmatpush3.bf16.msra.mxu1 %v3133_v0 }
 0x39a   : > { %1119 = vmatprep.subr.bf16.mxu0 %v3103_v60  ;;  %2365 = vmatprep.subr.bf16.mxu1 %v2808_v42 }
 0x39d   : > { %1120 = vmatpush1.bf16.msra.mxu0 %v3118_v62  ;;  %2366 = vmatpush3.bf16.msra.mxu1 %v3144_v1 }
 0x39e   : > { %1222 = vmatprep.subr.bf16.mxu0 %v2992_v40  ;;  %2371 = vmatprep.subr.bf16.mxu1 %v2808_v42 }
 0x453   : > { %v1022_v14 = vpop.f32.mrb[12].mxu0  ;;  %v1063_v15 = vpop.f32.mrb[12].mxu1 }
 0x454   : > { %v1023_v16 = vadd.f32 %v1022_v14, %v3190_v7  ;;  %v1024_v17 = vpop.f32.mrb[13].mxu0  ;;  %v2349_v18 = vpop.f32.mrb[13].mxu1  ;;  %v1064_v34 = vadd.f32 %v1063_v15, %v3200_v28 }
 0x455   : > { %v1025_v19 = vadd.f32 %v1024_v17, %v3192_v8  ;;  %v1026_v20 = vpop.f32.mrb[14].mxu0  ;;  %v1066_v21 = vpop.f32.mrb[14].mxu1 }
 0x456   : > { %v1069_v22 = vadd.f32 %v2103_v10, %v1023_v16  ;;  %v1027_v24 = vpop.f32.mrb[15].mxu0  ;;  %v2350_v25 = vpop.f32.mrb[15].mxu1  ;;  %v2112_v21 = vld [vmem:[%s3194_s29 + $0x68] sm:$0xff] }
 0x457   : > { %v1070_v27 = vadd.f32 %v2104_v23, %v1025_v19 }
 0x458   : > { %v2107_v26 = vmul.f32 -1.442695, %v1069_v22 }
 0x459   : > { %v2108_v29 = vmul.f32 -1.442695, %v1070_v27 }
 0x45a   : > { %2616 = vpow2.f32 %v2107_v26 }
 0x45b   : > { %2618 = vpow2.f32 %v2108_v29 }
 0x464   : > { %v2617_v30 = vpop.eup %2616 }
 0x465   : > { %v1077_v31 = vadd.f32 1.0, %v2617_v30  ;;  %v2619_v32 = vpop.eup %2618 }
 0x466   : > { %v1078_v33 = vadd.f32 1.0, %v2619_v32 }
 0x467   : > { %2620 = vrcp.f32 %v1077_v31 }
 0x468   : > { %2622 = vrcp.f32 %v1078_v33  ;;  %v2113_v33 = vld [vmem:[%s3194_s29 + $0x70] sm:$0xff] }
 0x471   : > { %v2621_v35 = vpop.eup %2620 }
 0x472   : > { %v1083_v37 = vmul.f32 %v2621_v35, %v1064_v34  ;;  %v2623_v39 = vpop.eup %2622 }
 0x473   : > { %v1086_v2 = vsub.f32 1.0, %v2623_v39  ;;  %v1088_v6 = vmul.f32 %v2623_v39, %v3322_v12 }
 0x474   : > { %v1084_v38 = vadd.f32 %v2105_v36, %v1083_v37 }
 0x476   : > { %2624 = vtanh.f32 %v1084_v38 }
 0x480   : > { %v2625_v3 = vpop.eup %2624 }
 0x481   : > { %v1087_v4 = vmul.f32 %v2625_v3, %v1086_v2  ;;  %v2114_v3 = vld [vmem:[%s3205_s9 + $0x20] sm:$0xff] }
 0x483   : > { %v1089_v11 = vadd.f32 %v1088_v6, %v1087_v4 }
 0x485   : > { %v1090_v5 = vmul.f32 %v2106_v9, %v1089_v11  ;;  %v1095_v13 = vsub.f32 %v1089_v11, %v3322_v12 }
 0x487   : > { %2109 = vst.msk [vmem:[%s3212_s14 + $0x18] sm:$0xff] %vm741_vm1, %v1090_v5  ;;  %v1096_v10 = vmul.f32 %v2106_v9, %v1095_v13 }
 0x488   : > { %2110 = vst.msk [vmem:[%s3212_s14 + $0x30] sm:$0xff] %vm744_vm2, %v1090_v5 }
 0x489   : > { %v3375_v14 = vadd.f32 %v1096_v10, %v3322_v12  ;;  %v3435_v10 = vld [vmem:[%s3902_s2] ss:$12 sps:$4 sm:$0xff]  }
 0x48b   : > { %v1104_v15 = vpack.c.bf16 %v3375_v14, %v3375_v14 }
 0x48d   : > { %1138 = vmatmul.mubr.bf16.vlgmr.msra.gmra.mrb[16].mxu0 %v1104_v15  ;;  %2368 = vmatmul.mubr.bf16.vlgmr.msra.gmra.mrb[16].mxu1 %v1104_v15  ;;  %v3442_v15 = vld [vmem:[%s3902_s2 + $0x1c] ss:$12 sps:$4 sm:$0xff]  }
 0x48e   : > { %1223 = vmatpush1.bf16.msra.mxu0 %v2997_v41  ;;  %2372 = vmatpush3.bf16.msra.mxu1 %v3036_v49  ;;  %v2111_v41 = vld [vmem:[%s3194_s29 + $0x60] sm:$0xff] }
 0x48f   : > { %1224 = vmatprep.subr.bf16.mxu0 %v3005_v44  ;;  %2373 = vmatprep.subr.bf16.mxu1 %v2808_v42 }
 0x490   : > { %1254 = vmatprep.mubr.bf16.mxu0 %v2809_v43  ;;  %2387 = vmatprep.mubr.msk.bf16.mxu1 %vm2810_vm0, %v2808_v42 }
 0x492   : > { %1225 = vmatpush1.bf16.msra.mxu0 %v3013_v45  ;;  %2374 = vmatpush3.bf16.msra.mxu1 %v3054_v52 }
 0x493   : > { %1226 = vmatprep.subr.bf16.mxu0 %v3019_v46  ;;  %2375 = vmatprep.subr.bf16.mxu1 %v2808_v42 }
 0x496   : > { %1227 = vmatpush1.bf16.msra.mxu0 %v3025_v47  ;;  %2376 = vmatpush3.bf16.msra.mxu1 %v3073_v55 }
 0x497   : > { %1228 = vmatprep.subr.bf16.mxu0 %v3031_v48  ;;  %2377 = vmatprep.subr.bf16.mxu1 %v2808_v42 }
 0x49a   : > { %1229 = vmatpush1.bf16.msra.mxu0 %v3042_v50  ;;  %2378 = vmatpush3.bf16.msra.mxu1 %v3090_v58 }
 0x49b   : > { %1230 = vmatprep.subr.bf16.mxu0 %v3047_v51  ;;  %2379 = vmatprep.subr.bf16.mxu1 %v2808_v42 }
 0x49e   : > { %1231 = vmatpush1.bf16.msra.mxu0 %v3060_v53  ;;  %2380 = vmatpush3.bf16.msra.mxu1 %v3111_v61 }
 0x49f   : > { %1232 = vmatprep.subr.bf16.mxu0 %v3066_v54  ;;  %2381 = vmatprep.subr.bf16.mxu1 %v2808_v42 }
 0x4a2   : > { %1233 = vmatpush1.bf16.msra.mxu0 %v3079_v56  ;;  %2382 = vmatpush3.bf16.msra.mxu1 %v3125_v63 }
 0x4a3   : > { %1234 = vmatprep.subr.bf16.mxu0 %v3084_v57  ;;  %2383 = vmatprep.subr.bf16.mxu1 %v2808_v42 }
 0x4a6   : > { %1235 = vmatpush1.bf16.msra.mxu0 %v3097_v59  ;;  %2384 = vmatpush3.bf16.msra.mxu1 %v3133_v0 }
 0x4a7   : > { %1236 = vmatprep.subr.bf16.mxu0 %v3103_v60  ;;  %2385 = vmatprep.subr.bf16.mxu1 %v2808_v42 }
 0x4aa   : > { %1237 = vmatpush1.bf16.msra.mxu0 %v3118_v62  ;;  %2386 = vmatpush3.bf16.msra.mxu1 %v3144_v1 }
 0x4ab   : > { %1337 = vmatprep.subr.bf16.mxu0 %v2992_v40  ;;  %2391 = vmatprep.subr.bf16.mxu1 %v2808_v42 }
 0x560   : > { %v1139_v44 = vpop.f32.mrb[16].mxu0  ;;  %v1180_v45 = vpop.f32.mrb[16].mxu1 }
 0x561   : > { %v1140_v46 = vadd.f32 %v1139_v44, %v3190_v7  ;;  %v1141_v12 = vpop.f32.mrb[17].mxu0  ;;  %v2369_v16 = vpop.f32.mrb[17].mxu1  ;;  %v1181_v31 = vadd.f32 %v1180_v45, %v3200_v28 }
 0x562   : > { %v1142_v17 = vadd.f32 %v1141_v12, %v3192_v8  ;;  %v1143_v18 = vpop.f32.mrb[18].mxu0  ;;  %v1183_v19 = vpop.f32.mrb[18].mxu1  ;;  %v2121_v16 = vld [vmem:[%s3194_s29 + $0x88] sm:$0xff] }
 0x563   : > { %v1186_v20 = vadd.f32 %v2111_v41, %v1140_v46  ;;  %v1144_v22 = vpop.f32.mrb[19].mxu0  ;;  %v2370_v23 = vpop.f32.mrb[19].mxu1 }
 0x564   : > { %v1187_v40 = vadd.f32 %v2112_v21, %v1142_v17 }
 0x565   : > { %v2115_v24 = vmul.f32 -1.442695, %v1186_v20 }
 0x566   : > { %v2116_v25 = vmul.f32 -1.442695, %v1187_v40 }
 0x567   : > { %2626 = vpow2.f32 %v2115_v24  ;;  %v2122_v24 = vld [vmem:[%s3205_s9 + $0x28] sm:$0xff] }
 0x568   : > { %2628 = vpow2.f32 %v2116_v25 }
 0x571   : > { %v2627_v26 = vpop.eup %2626 }
 0x572   : > { %v1194_v27 = vadd.f32 1.0, %v2627_v26  ;;  %v2629_v29 = vpop.eup %2628 }
 0x573   : > { %v1195_v30 = vadd.f32 1.0, %v2629_v29 }
 0x574   : > { %2630 = vrcp.f32 %v1194_v27 }
 0x575   : > { %2632 = vrcp.f32 %v1195_v30 }
 0x57e   : > { %v2631_v32 = vpop.eup %2630 }
 0x57f   : > { %v1200_v34 = vmul.f32 %v2631_v32, %v1181_v31  ;;  %v2633_v36 = vpop.eup %2632  ;;  %v3514_v31 = vld [vmem:[%s3902_s2 + $0x8] ss:$12 sps:$4 sm:$0xff]   ;;  %v3526_v32 = vld [vmem:[%s3902_s2 + $0x20] ss:$12 sps:$4 sm:$0xff]  }
 0x580   : > { %v1203_v37 = vsub.f32 1.0, %v2633_v36  ;;  %v1205_v2 = vmul.f32 %v2633_v36, %v3375_v14  ;;  %v3553_v36 = vld [vmem:[%s3902_s2 + $0x48] ss:$12 sps:$4 sm:$0xff]  }
 0x581   : > { %v1201_v35 = vadd.f32 %v2113_v33, %v1200_v34  ;;  %v3534_v33 = vld [vmem:[%s3902_s2 + $0x30] ss:$12 sps:$4 sm:$0xff]   ;;  %v3540_v34 = vld [vmem:[%s3902_s2 + $0x38] ss:$12 sps:$4 sm:$0xff]  }
 0x583   : > { %2634 = vtanh.f32 %v1201_v35  ;;  %v3546_v35 = vld [vmem:[%s3902_s2 + $0x4c] ss:$12 sps:$4 sm:$0xff]  }
 0x58d   : > { %v2635_v38 = vpop.eup %2634 }
 0x58e   : > { %v1204_v39 = vmul.f32 %v2635_v38, %v1203_v37  ;;  %v3559_v37 = vld [vmem:[%s3902_s2 + $0x50] ss:$12 sps:$4 sm:$0xff]  }
 0x58f   : > { %v3565_v38 = vld [vmem:[%s3902_s2 + $0x64] ss:$12 sps:$4 sm:$0xff]  }
 0x590   : > { %v1206_v4 = vadd.f32 %v1205_v2, %v1204_v39  ;;  %v3572_v39 = vld [vmem:[%s3902_s2 + $0x60] ss:$12 sps:$4 sm:$0xff]   ;;  %v3578_v2 = vld [vmem:[%s3902_s2 + $0x68] ss:$12 sps:$4 sm:$0xff]  }
 0x592   : > { %v1207_v6 = vmul.f32 %v2114_v3, %v1206_v4  ;;  %v1212_v9 = vsub.f32 %v1206_v4, %v3375_v14  ;;  %v3591_v4 = vld [vmem:[%s3902_s2 + $0x78] ss:$12 sps:$4 sm:$0xff]  }
 0x594   : > { %2117 = vst.msk [vmem:[%s3212_s14 + $0x20] sm:$0xff] %vm741_vm1, %v1207_v6  ;;  %v1213_v11 = vmul.f32 %v2114_v3, %v1212_v9  ;;  %v3584_v3 = vld [vmem:[%s3902_s2 + $0x7c] ss:$12 sps:$4 sm:$0xff]   ;;  %v3603_v9 = vld [vmem:[%s3902_s2 + $0x94] ss:$12 sps:$4 sm:$0xff]  }
 0x595   : > { %2118 = vst.msk [vmem:[%s3212_s14 + $0x28] sm:$0xff] %vm744_vm2, %v1207_v6  ;;  %v3597_v6 = vld [vmem:[%s3902_s2 + $0x80] ss:$12 sps:$4 sm:$0xff]  }
 0x596   : > { %v3428_v5 = vadd.f32 %v1213_v11, %v3375_v14  ;;  %v3452_v14 = vld [vmem:[%s3902_s2 + $0x18] ss:$12 sps:$4 sm:$0xff]   ;;  %v3610_v11 = vld [vmem:[%s3902_s2 + $0x90] ss:$12 sps:$4 sm:$0xff]  }
 0x598   : > { %v1221_v13 = vpack.c.bf16 %v3428_v5, %v3428_v5 }
 0x59a   : > { %1255 = vmatmul.mubr.bf16.vlgmr.msra.gmra.mrb[20].mxu0 %v1221_v13  ;;  %2388 = vmatmul.mubr.bf16.vlgmr.msra.gmra.mrb[20].mxu1 %v1221_v13  ;;  %v3622_v13 = vld [vmem:[%s3902_s2 + $0xac] ss:$12 sps:$4 sm:$0xff]  }
 0x59b   : > { %1338 = vmatpush1.bf16.msra.mxu0 %v3435_v10  ;;  %2392 = vmatpush3.bf16.msra.mxu1 %v3036_v49  ;;  %v3459_v49 = vld [vmem:[%s3902_s2 + $0x34] ss:$12 sps:$4 sm:$0xff]  }
 0x59c   : > { %1339 = vmatprep.subr.bf16.mxu0 %v3442_v15  ;;  %2393 = vmatprep.subr.bf16.mxu1 %v2808_v42 }
 0x59d   : > { %1369 = vmatprep.mubr.bf16.mxu0 %v2809_v43  ;;  %2407 = vmatprep.mubr.msk.bf16.mxu1 %vm2810_vm0, %v2808_v42 }
 0x59f   : > { %1340 = vmatpush1.bf16.msra.mxu0 %v3452_v14  ;;  %2394 = vmatpush3.bf16.msra.mxu1 %v3054_v52 }
 0x5a0   : > { %1341 = vmatprep.subr.bf16.mxu0 %v3459_v49  ;;  %2395 = vmatprep.subr.bf16.mxu1 %v2808_v42 }
 0x5a3   : > { %1342 = vmatpush1.bf16.msra.mxu0 %v3025_v47  ;;  %2396 = vmatpush3.bf16.msra.mxu1 %v3073_v55  ;;  %v3488_v47 = vld [vmem:[%s3902_s2 + $0x4] ss:$12 sps:$4 sm:$0xff]  }
 0x5a4   : > { %1343 = vmatprep.subr.bf16.mxu0 %v3031_v48  ;;  %2397 = vmatprep.subr.bf16.mxu1 %v2808_v42  ;;  %v2119_v48 = vld [vmem:[%s3194_s29 + $0x78] sm:$0xff] }
 0x5a7   : > { %1344 = vmatpush1.bf16.msra.mxu0 %v3042_v50  ;;  %2398 = vmatpush3.bf16.msra.mxu1 %v3090_v58 }
 0x5a8   : > { %1345 = vmatprep.subr.bf16.mxu0 %v3047_v51  ;;  %2399 = vmatprep.subr.bf16.mxu1 %v2808_v42 }
 0x5ab   : > { %1346 = vmatpush1.bf16.msra.mxu0 %v3060_v53  ;;  %2400 = vmatpush3.bf16.msra.mxu1 %v3111_v61 }
 0x5ac   : > { %1347 = vmatprep.subr.bf16.mxu0 %v3066_v54  ;;  %2401 = vmatprep.subr.bf16.mxu1 %v2808_v42 }
 0x5af   : > { %1348 = vmatpush1.bf16.msra.mxu0 %v3079_v56  ;;  %2402 = vmatpush3.bf16.msra.mxu1 %v3125_v63 }
 0x5b0   : > { %1349 = vmatprep.subr.bf16.mxu0 %v3084_v57  ;;  %2403 = vmatprep.subr.bf16.mxu1 %v2808_v42 }
 0x5b3   : > { %1350 = vmatpush1.bf16.msra.mxu0 %v3097_v59  ;;  %2404 = vmatpush3.bf16.msra.mxu1 %v3133_v0  ;;  %v2120_v59 = vld [vmem:[%s3194_s29 + $0x80] sm:$0xff] }
 0x5b4   : > { %1351 = vmatprep.subr.bf16.mxu0 %v3103_v60  ;;  %2405 = vmatprep.subr.bf16.mxu1 %v2808_v42 }
 0x5b7   : > { %1352 = vmatpush1.bf16.msra.mxu0 %v3118_v62  ;;  %2406 = vmatpush3.bf16.msra.mxu1 %v3144_v1 }
 0x5b8   : > { %1452 = vmatprep.subr.bf16.mxu0 %v3488_v47  ;;  %2411 = vmatprep.subr.bf16.mxu1 %v2808_v42 }
 0x66d   : > { %v1256_v50 = vpop.f32.mrb[20].mxu0  ;;  %v1297_v51 = vpop.f32.mrb[20].mxu1 }
 0x66e   : > { %v1257_v52 = vadd.f32 %v1256_v50, %v3190_v7  ;;  %v1258_v53 = vpop.f32.mrb[21].mxu0  ;;  %v2389_v54 = vpop.f32.mrb[21].mxu1  ;;  %v1298_v46 = vadd.f32 %v1297_v51, %v3200_v28  ;;  %v3635_v50 = vld [vmem:[%s3902_s2 + $0xb0] ss:$12 sps:$4 sm:$0xff]  }
 0x66f   : > { %v1259_v55 = vadd.f32 %v1258_v53, %v3192_v8  ;;  %v1260_v56 = vpop.f32.mrb[22].mxu0  ;;  %v1300_v57 = vpop.f32.mrb[22].mxu1  ;;  %v2127_v51 = vld [vmem:[%s3194_s29 + $0x90] sm:$0xff] }
 0x670   : > { %v1303_v58 = vadd.f32 %v2119_v48, %v1257_v52  ;;  %v1261_v60 = vpop.f32.mrb[23].mxu0  ;;  %v2390_v61 = vpop.f32.mrb[23].mxu1  ;;  %v3629_v48 = vld [vmem:[%s3902_s2 + $0xa8] ss:$12 sps:$4 sm:$0xff]  }
 0x671   : > { %v1304_v63 = vadd.f32 %v2120_v59, %v1259_v55  ;;  %v2128_v61 = vld [vmem:[%s3194_s29 + $0x98] sm:$0xff] }
 0x672   : > { %v2123_v62 = vmul.f32 -1.442695, %v1303_v58 }
 0x673   : > { %v2124_v0 = vmul.f32 -1.442695, %v1304_v63 }
 0x674   : > { %2636 = vpow2.f32 %v2123_v62 }
 0x675   : > { %2638 = vpow2.f32 %v2124_v0 }
 0x67e   : > { %v2637_v1 = vpop.eup %2636 }
 0x67f   : > { %v1311_v41 = vadd.f32 1.0, %v2637_v1  ;;  %v2639_v44 = vpop.eup %2638 }
 0x680   : > { %v1312_v45 = vadd.f32 1.0, %v2639_v44 }
 0x681   : > { %2640 = vrcp.f32 %v1311_v41 }
 0x682   : > { %2642 = vrcp.f32 %v1312_v45 }
 0x68b   : > { %v2641_v12 = vpop.eup %2640 }
 0x68c   : > { %v1317_v17 = vmul.f32 %v2641_v12, %v1298_v46  ;;  %v2643_v19 = vpop.eup %2642 }
 0x68d   : > { %v1320_v20 = vsub.f32 1.0, %v2643_v19  ;;  %v1322_v23 = vmul.f32 %v2643_v19, %v3428_v5 }
 0x68e   : > { %v1318_v18 = vadd.f32 %v2121_v16, %v1317_v17 }
 0x690   : > { %2644 = vtanh.f32 %v1318_v18  ;;  %v2129_v18 = vld [vmem:[%s3194_s29 + $0xa0] sm:$0xff] }
 0x69a   : > { %v2645_v21 = vpop.eup %2644 }
 0x69b   : > { %v1321_v22 = vmul.f32 %v2645_v21, %v1320_v20 }
 0x69d   : > { %v1323_v40 = vadd.f32 %v1322_v23, %v1321_v22 }
 0x69f   : > { %v1324_v25 = vmul.f32 %v2122_v24, %v1323_v40  ;;  %v1327_v26 = vsub.f32 %v1323_v40, %v3428_v5 }
 0x6a1   : > { %2125 = vst.msk [vmem:[%s3212_s14 + $0x28] sm:$0xff] %vm741_vm1, %v1324_v25  ;;  %v1328_v27 = vmul.f32 %v2122_v24, %v1327_v26 }
 0x6a2   : > { %2126 = vst.msk [vmem:[%s3212_s14 + $0x20] sm:$0xff] %vm744_vm2, %v1324_v25  ;;  %v2130_v25 = vld [vmem:[%s3205_s9 + $0x30] sm:$0xff] }
 0x6a3   : > { %v3506_v29 = vadd.f32 %v1328_v27, %v3428_v5  ;;  %v3616_v5 = vld [vmem:[%s3902_s2 + $0x98] ss:$12 sps:$4 sm:$0xff]  }
 0x6a5   : > { %v1336_v30 = vpack.c.bf16 %v3506_v29, %v3506_v29 }
 0x6a7   : > { %1370 = vmatmul.mubr.bf16.vlgmr.msra.gmra.mrb[24].mxu0 %v1336_v30  ;;  %2408 = vmatmul.mubr.bf16.vlgmr.msra.gmra.mrb[24].mxu1 %v1336_v30 }
 0x6a8   : > { %1453 = vmatpush1.bf16.msra.mxu0 %v3435_v10  ;;  %2412 = vmatpush3.bf16.msra.mxu1 %v3514_v31 }
 0x6a9   : > { %1454 = vmatprep.subr.bf16.mxu0 %v3442_v15  ;;  %2413 = vmatprep.subr.bf16.mxu1 %v2808_v42 }
 0x6aa   : > { %1484 = vmatprep.mubr.bf16.mxu0 %v2809_v43  ;;  %2427 = vmatprep.mubr.msk.bf16.mxu1 %vm2810_vm0, %v2808_v42 }
 0x6ac   : > { %1455 = vmatpush1.bf16.msra.mxu0 %v3452_v14  ;;  %2414 = vmatpush3.bf16.msra.mxu1 %v3526_v32 }
 0x6ad   : > { %1456 = vmatprep.subr.bf16.mxu0 %v3459_v49  ;;  %2415 = vmatprep.subr.bf16.mxu1 %v2808_v42 }
 0x6b0   : > { %1457 = vmatpush1.bf16.msra.mxu0 %v3534_v33  ;;  %2416 = vmatpush3.bf16.msra.mxu1 %v3540_v34 }
 0x6b1   : > { %1458 = vmatprep.subr.bf16.mxu0 %v3546_v35  ;;  %2417 = vmatprep.subr.bf16.mxu1 %v2808_v42 }
 0x6b4   : > { %1459 = vmatpush1.bf16.msra.mxu0 %v3553_v36  ;;  %2418 = vmatpush3.bf16.msra.mxu1 %v3559_v37 }
 0x6b5   : > { %1460 = vmatprep.subr.bf16.mxu0 %v3565_v38  ;;  %2419 = vmatprep.subr.bf16.mxu1 %v2808_v42 }
 0x6b8   : > { %1461 = vmatpush1.bf16.msra.mxu0 %v3572_v39  ;;  %2420 = vmatpush3.bf16.msra.mxu1 %v3578_v2 }
 0x6b9   : > { %1462 = vmatprep.subr.bf16.mxu0 %v3584_v3  ;;  %2421 = vmatprep.subr.bf16.mxu1 %v2808_v42 }
 0x6bc   : > { %1463 = vmatpush1.bf16.msra.mxu0 %v3591_v4  ;;  %2422 = vmatpush3.bf16.msra.mxu1 %v3597_v6 }
 0x6bd   : > { %1464 = vmatprep.subr.bf16.mxu0 %v3603_v9  ;;  %2423 = vmatprep.subr.bf16.mxu1 %v2808_v42 }
 0x6c0   : > { %1465 = vmatpush1.bf16.msra.mxu0 %v3610_v11  ;;  %2424 = vmatpush3.bf16.msra.mxu1 %v3616_v5 }
 0x6c1   : > { %1466 = vmatprep.subr.bf16.mxu0 %v3622_v13  ;;  %2425 = vmatprep.subr.bf16.mxu1 %v2808_v42 }
 0x6c4   : > { %1467 = vmatpush1.bf16.msra.mxu0 %v3629_v48  ;;  %2426 = vmatpush3.bf16.msra.mxu1 %v3635_v50 }
 0x6c5   : > { %1567 = vmatprep.subr.bf16.mxu0 %v3488_v47  ;;  %2431 = vmatprep.subr.bf16.mxu1 %v2808_v42 }
 0x77a   : > { %v1371_v52 = vpop.f32.mrb[24].mxu0  ;;  %v1412_v53 = vpop.f32.mrb[24].mxu1 }
 0x77b   : > { %v1372_v54 = vadd.f32 %v1371_v52, %v3190_v7  ;;  %v1373_v55 = vpop.f32.mrb[25].mxu0  ;;  %v2409_v56 = vpop.f32.mrb[25].mxu1  ;;  %v1413_v16 = vadd.f32 %v1412_v53, %v3200_v28 }
 0x77c   : > { %v1374_v57 = vadd.f32 %v1373_v55, %v3192_v8  ;;  %v1375_v58 = vpop.f32.mrb[26].mxu0  ;;  %v1415_v59 = vpop.f32.mrb[26].mxu1 }
 0x77d   : > { %v1418_v60 = vadd.f32 %v2127_v51, %v1372_v54  ;;  %v1376_v62 = vpop.f32.mrb[27].mxu0  ;;  %v2410_v63 = vpop.f32.mrb[27].mxu1 }
 0x77e   : > { %v1419_v1 = vadd.f32 %v2128_v61, %v1374_v57  ;;  %v2136_v63 = vld [vmem:[%s3194_s29 + $0xb0] sm:$0xff] }
 0x77f   : > { %v2131_v0 = vmul.f32 -1.442695, %v1418_v60 }
 0x780   : > { %v2132_v41 = vmul.f32 -1.442695, %v1419_v1 }
 0x781   : > { %2646 = vpow2.f32 %v2131_v0 }
 0x782   : > { %2648 = vpow2.f32 %v2132_v41 }
 0x78b   : > { %v2647_v44 = vpop.eup %2646 }
 0x78c   : > { %v1426_v45 = vadd.f32 1.0, %v2647_v44  ;;  %v2649_v46 = vpop.eup %2648 }
 0x78d   : > { %v1427_v12 = vadd.f32 1.0, %v2649_v46 }
 0x78e   : > { %2650 = vrcp.f32 %v1426_v45 }
 0x78f   : > { %2652 = vrcp.f32 %v1427_v12 }
 0x798   : > { %v2651_v17 = vpop.eup %2650 }
 0x799   : > { %v1432_v19 = vmul.f32 %v2651_v17, %v1413_v16  ;;  %v2653_v21 = vpop.eup %2652 }
 0x79a   : > { %v1435_v22 = vsub.f32 1.0, %v2653_v21  ;;  %v1437_v40 = vmul.f32 %v2653_v21, %v3506_v29 }
 0x79b   : > { %v1433_v20 = vadd.f32 %v2129_v18, %v1432_v19  ;;  %v2137_v19 = vld [vmem:[%s3194_s29 + $0xb8] sm:$0xff] }
 0x79d   : > { %2654 = vtanh.f32 %v1433_v20 }
 0x7a7   : > { %v2655_v23 = vpop.eup %2654 }
 0x7a8   : > { %v1436_v24 = vmul.f32 %v2655_v23, %v1435_v22 }
 0x7aa   : > { %v1438_v26 = vadd.f32 %v1437_v40, %v1436_v24 }
 0x7ac   : > { %v1439_v27 = vmul.f32 %v2130_v25, %v1438_v26  ;;  %v1442_v30 = vsub.f32 %v1438_v26, %v3506_v29  ;;  %v2138_v26 = vld [vmem:[%s3205_s9 + $0x38] sm:$0xff] }
 0x7ae   : > { %2133 = vst.msk [vmem:[%s3212_s14 + $0x30] sm:$0xff] %vm741_vm1, %v1439_v27  ;;  %v1443_v51 = vmul.f32 %v2130_v25, %v1442_v30 }
 0x7af   : > { %2134 = vst.msk [vmem:[%s3212_s14 + $0x18] sm:$0xff] %vm744_vm2, %v1439_v27 }
 0x7b0   : > { %v3654_v52 = vadd.f32 %v1443_v51, %v3506_v29  ;;  %v2135_v29 = vld [vmem:[%s3194_s29 + $0xa8] sm:$0xff] }
 0x7b2   : > { %v1451_v53 = vpack.c.bf16 %v3654_v52, %v3654_v52 }
 0x7b4   : > { %1485 = vmatmul.mubr.bf16.vlgmr.msra.gmra.mrb[28].mxu0 %v1451_v53  ;;  %2428 = vmatmul.mubr.bf16.vlgmr.msra.gmra.mrb[28].mxu1 %v1451_v53 }
 0x7b5   : > { %1568 = vmatpush1.bf16.msra.mxu0 %v3435_v10  ;;  %2432 = vmatpush3.bf16.msra.mxu1 %v3514_v31 }
 0x7b6   : > { %1569 = vmatprep.subr.bf16.mxu0 %v3442_v15  ;;  %2433 = vmatprep.subr.bf16.mxu1 %v2808_v42 }
 0x7b7   : > { %1599 = vmatprep.mubr.bf16.mxu0 %v2809_v43  ;;  %2447 = vmatprep.mubr.msk.bf16.mxu1 %vm2810_vm0, %v2808_v42 }
 0x7b9   : > { %1570 = vmatpush1.bf16.msra.mxu0 %v3452_v14  ;;  %2434 = vmatpush3.bf16.msra.mxu1 %v3526_v32 }
 0x7ba   : > { %1571 = vmatprep.subr.bf16.mxu0 %v3459_v49  ;;  %2435 = vmatprep.subr.bf16.mxu1 %v2808_v42 }
 0x7bd   : > { %1572 = vmatpush1.bf16.msra.mxu0 %v3534_v33  ;;  %2436 = vmatpush3.bf16.msra.mxu1 %v3540_v34 }
 0x7be   : > { %1573 = vmatprep.subr.bf16.mxu0 %v3546_v35  ;;  %2437 = vmatprep.subr.bf16.mxu1 %v2808_v42 }
 0x7c1   : > { %1574 = vmatpush1.bf16.msra.mxu0 %v3553_v36  ;;  %2438 = vmatpush3.bf16.msra.mxu1 %v3559_v37 }
 0x7c2   : > { %1575 = vmatprep.subr.bf16.mxu0 %v3565_v38  ;;  %2439 = vmatprep.subr.bf16.mxu1 %v2808_v42 }
 0x7c5   : > { %1576 = vmatpush1.bf16.msra.mxu0 %v3572_v39  ;;  %2440 = vmatpush3.bf16.msra.mxu1 %v3578_v2 }
 0x7c6   : > { %1577 = vmatprep.subr.bf16.mxu0 %v3584_v3  ;;  %2441 = vmatprep.subr.bf16.mxu1 %v2808_v42 }
 0x7c9   : > { %1578 = vmatpush1.bf16.msra.mxu0 %v3591_v4  ;;  %2442 = vmatpush3.bf16.msra.mxu1 %v3597_v6 }
 0x7ca   : > { %1579 = vmatprep.subr.bf16.mxu0 %v3603_v9  ;;  %2443 = vmatprep.subr.bf16.mxu1 %v2808_v42 }
 0x7cd   : > { %1580 = vmatpush1.bf16.msra.mxu0 %v3610_v11  ;;  %2444 = vmatpush3.bf16.msra.mxu1 %v3616_v5 }
 0x7ce   : > { %1581 = vmatprep.subr.bf16.mxu0 %v3622_v13  ;;  %2445 = vmatprep.subr.bf16.mxu1 %v2808_v42 }
 0x7d1   : > { %1582 = vmatpush1.bf16.msra.mxu0 %v3629_v48  ;;  %2446 = vmatpush3.bf16.msra.mxu1 %v3635_v50 }
 0x7d2   : > { %1682 = vmatprep.subr.bf16.mxu0 %v3488_v47  ;;  %2451 = vmatprep.subr.bf16.mxu1 %v2808_v42 }
 0x887   : > { %v1486_v54 = vpop.f32.mrb[28].mxu0  ;;  %v1527_v55 = vpop.f32.mrb[28].mxu1 }
 0x888   : > { %v1487_v56 = vadd.f32 %v1486_v54, %v3190_v7  ;;  %v1488_v57 = vpop.f32.mrb[29].mxu0  ;;  %v2429_v58 = vpop.f32.mrb[29].mxu1  ;;  %v1528_v17 = vadd.f32 %v1527_v55, %v3200_v28 }
 0x889   : > { %v1489_v59 = vadd.f32 %v1488_v57, %v3192_v8  ;;  %v1490_v60 = vpop.f32.mrb[30].mxu0  ;;  %v1530_v61 = vpop.f32.mrb[30].mxu1 }
 0x88a   : > { %v1533_v62 = vadd.f32 %v2135_v29, %v1487_v56  ;;  %v1491_v0 = vpop.f32.mrb[31].mxu0  ;;  %v2430_v1 = vpop.f32.mrb[31].mxu1  ;;  %v2146_v60 = vld [vmem:[%s3205_s9 + $0x40] sm:$0xff] }
 0x88b   : > { %v1534_v47 = vadd.f32 %v2136_v63, %v1489_v59 }
 0x88c   : > { %v2139_v41 = vmul.f32 -1.442695, %v1533_v62 }
 0x88d   : > { %v2140_v44 = vmul.f32 -1.442695, %v1534_v47  ;;  %v2578_v47 = vld [vmem:[%s3904_s4] sm:$0xff]  }
 0x88e   : > { %2656 = vpow2.f32 %v2139_v41 }
 0x88f   : > { %2658 = vpow2.f32 %v2140_v44  ;;  %v2579_v44 = vld [vmem:[%s3904_s4 + $0x8] sm:$0xff]  }
 0x898   : > { %v2657_v45 = vpop.eup %2656 }
 0x899   : > { %v1541_v46 = vadd.f32 1.0, %v2657_v45  ;;  %v2659_v12 = vpop.eup %2658  ;;  %v2580_v45 = vld [vmem:[%s3904_s4 + $0x10] sm:$0xff]  }
 0x89a   : > { %v1542_v16 = vadd.f32 1.0, %v2659_v12  ;;  %v2582_v12 = vld [vmem:[%s3904_s4 + $0x20] sm:$0xff]  }
 0x89b   : > { %2660 = vrcp.f32 %v1541_v46  ;;  %v2581_v46 = vld [vmem:[%s3904_s4 + $0x18] sm:$0xff]  }
 0x89c   : > { %2662 = vrcp.f32 %v1542_v16  ;;  %v2583_v16 = vld [vmem:[%s3904_s4 + $0x28] sm:$0xff]  }
 0x8a5   : > { %v2661_v18 = vpop.eup %2660 }
 0x8a6   : > { %v1547_v20 = vmul.f32 %v2661_v18, %v1528_v17  ;;  %v2663_v22 = vpop.eup %2662  ;;  %v2584_v17 = vld [vmem:[%s3904_s4 + $0x30] sm:$0xff]   ;;  %v2585_v18 = vld [vmem:[%s3904_s4 + $0x38] sm:$0xff]  }
 0x8a7   : > { %v1550_v23 = vsub.f32 1.0, %v2663_v22  ;;  %v1552_v25 = vmul.f32 %v2663_v22, %v3654_v52 }
 0x8a8   : > { %v1548_v21 = vadd.f32 %v2137_v19, %v1547_v20  ;;  %v2151_v19 = vld [vmem:[%s3194_s29 + $0xd8] sm:$0xff] }
 0x8aa   : > { %2664 = vtanh.f32 %v1548_v21 }
 0x8b4   : > { %v2665_v24 = vpop.eup %2664 }
 0x8b5   : > { %v1551_v40 = vmul.f32 %v2665_v24, %v1550_v23 }
 0x8b7   : > { %v1553_v27 = vadd.f32 %v1552_v25, %v1551_v40 }
 0x8b9   : > { %v1554_v30 = vmul.f32 %v2138_v26, %v1553_v27  ;;  %v1557_v51 = vsub.f32 %v1553_v27, %v3654_v52 }
 0x8bb   : > { %2141 = vst.msk [vmem:[%s3212_s14 + $0x38] sm:$0xff] %vm741_vm1, %v1554_v30  ;;  %v1558_v53 = vmul.f32 %v2138_v26, %v1557_v51 }
 0x8bc   : > { %2142 = vst.msk [vmem:[%s3212_s14 + $0x10] sm:$0xff] %vm744_vm2, %v1554_v30  ;;  %v2152_v30 = vld [vmem:[%s3194_s29 + $0xe0] sm:$0xff] }
 0x8bd   : > { %v3707_v29 = vadd.f32 %v1558_v53, %v3654_v52 }
 0x8bf   : > { %v1566_v54 = vpack.c.bf16 %v3707_v29, %v3707_v29 }
 0x8c1   : > { %1600 = vmatmul.mubr.bf16.vlgmr.msra.gmra.mrb[32].mxu0 %v1566_v54  ;;  %2448 = vmatmul.mubr.bf16.vlgmr.msra.gmra.mrb[32].mxu1 %v1566_v54 }
 0x8c2   : > { %1683 = vmatpush1.bf16.msra.mxu0 %v3435_v10  ;;  %2452 = vmatpush3.bf16.msra.mxu1 %v3514_v31 }
 0x8c3   : > { %1684 = vmatprep.subr.bf16.mxu0 %v3442_v15  ;;  %2453 = vmatprep.subr.bf16.mxu1 %v2808_v42 }
 0x8c4   : > { %1714 = vmatprep.mubr.bf16.mxu0 %v2809_v43  ;;  %2467 = vmatprep.mubr.msk.bf16.mxu1 %vm2810_vm0, %v2808_v42  ;;  %v2143_v43 = vld [vmem:[%s3194_s29 + $0xc0] sm:$0xff] }
 0x8c6   : > { %1685 = vmatpush1.bf16.msra.mxu0 %v3452_v14  ;;  %2454 = vmatpush3.bf16.msra.mxu1 %v3526_v32 }
 0x8c7   : > { %1686 = vmatprep.subr.bf16.mxu0 %v3459_v49  ;;  %2455 = vmatprep.subr.bf16.mxu1 %v2808_v42 }
 0x8ca   : > { %1687 = vmatpush1.bf16.msra.mxu0 %v3534_v33  ;;  %2456 = vmatpush3.bf16.msra.mxu1 %v3540_v34 }
 0x8cb   : > { %1688 = vmatprep.subr.bf16.mxu0 %v3546_v35  ;;  %2457 = vmatprep.subr.bf16.mxu1 %v2808_v42 }
 0x8ce   : > { %1689 = vmatpush1.bf16.msra.mxu0 %v3553_v36  ;;  %2458 = vmatpush3.bf16.msra.mxu1 %v3559_v37  ;;  %v2144_v36 = vld [vmem:[%s3194_s29 + $0xc8] sm:$0xff] }
 0x8cf   : > { %1690 = vmatprep.subr.bf16.mxu0 %v3565_v38  ;;  %2459 = vmatprep.subr.bf16.mxu1 %v2808_v42 }
 0x8d2   : > { %1691 = vmatpush1.bf16.msra.mxu0 %v3572_v39  ;;  %2460 = vmatpush3.bf16.msra.mxu1 %v3578_v2 }
 0x8d3   : > { %1692 = vmatprep.subr.bf16.mxu0 %v3584_v3  ;;  %2461 = vmatprep.subr.bf16.mxu1 %v2808_v42 }
 0x8d6   : > { %1693 = vmatpush1.bf16.msra.mxu0 %v3591_v4  ;;  %2462 = vmatpush3.bf16.msra.mxu1 %v3597_v6 }
 0x8d7   : > { %1694 = vmatprep.subr.bf16.mxu0 %v3603_v9  ;;  %2463 = vmatprep.subr.bf16.mxu1 %v2808_v42 }
 0x8da   : > { %1695 = vmatpush1.bf16.msra.mxu0 %v3610_v11  ;;  %2464 = vmatpush3.bf16.msra.mxu1 %v3616_v5 }
 0x8db   : > { %1696 = vmatprep.subr.bf16.mxu0 %v3622_v13  ;;  %2465 = vmatprep.subr.bf16.mxu1 %v2808_v42 }
 0x8de   : > { %1697 = vmatpush1.bf16.msra.mxu0 %v3629_v48  ;;  %2466 = vmatpush3.bf16.msra.mxu1 %v3635_v50  ;;  %v2145_v48 = vld [vmem:[%s3194_s29 + $0xd0] sm:$0xff] }
 0x8df   : > { %2471 = vmatprep.subr.bf16.mxu0 %v2808_v42 }
 0x994   : > { %v1601_v10 = vpop.f32.mrb[32].mxu0  ;;  %v1642_v15 = vpop.f32.mrb[32].mxu1 }
 0x995   : > { %v1602_v14 = vadd.f32 %v1601_v10, %v3190_v7  ;;  %v1603_v49 = vpop.f32.mrb[33].mxu0  ;;  %v2449_v31 = vpop.f32.mrb[33].mxu1  ;;  %v1643_v5 = vadd.f32 %v1642_v15, %v3200_v28 }
 0x996   : > { %v1604_v32 = vadd.f32 %v1603_v49, %v3192_v8  ;;  %v1605_v33 = vpop.f32.mrb[34].mxu0  ;;  %v1645_v34 = vpop.f32.mrb[34].mxu1  ;;  %v2153_v49 = vld [vmem:[%s3194_s29 + $0xe8] sm:$0xff]  ;;  %s3812_s29 = sshll.u32 %s2052_s28, 7  ;;  %s2811_s28 = smov [#allocation4]  }
 0x997   : > { %v1648_v35 = vadd.f32 %v2143_v43, %v1602_v14  ;;  %v1606_v37 = vpop.f32.mrb[35].mxu0  ;;  %v2450_v38 = vpop.f32.mrb[35].mxu1  ;;  %s3819_s21 = scalar_lea.hbm %s3906_s6, %s3812_s29  ;;  %s2716_s8 = sshll.u32 %s2811_s28, 4  ;;  %s2717_s8 = int_to_ptr.vmem [resolvable:$false] %s2716_s8 }
 0x998   : > { %v1649_v2 = vadd.f32 %v2144_v36, %v1604_v32  ;;  %v2154_v38 = vld [vmem:[%s3205_s9 + $0x48] sm:$0xff]  ;;  %p2719_p2 = scmp.lt.s32.totalorder %s3821_s18, %s2717_s8 }
 0x999   : > { %v2147_v39 = vmul.f32 -1.442695, %v1648_v35 }
 0x99a   : > { %v2148_v3 = vmul.f32 -1.442695, %v1649_v2 }
 0x99b   : > { %2666 = vpow2.f32 %v2147_v39 }
 0x99c   : > { %2668 = vpow2.f32 %v2148_v3 }
 0x9a5   : > { %v2667_v4 = vpop.eup %2666 }
 0x9a6   : > { %v1656_v6 = vadd.f32 1.0, %v2667_v4  ;;  %v2669_v9 = vpop.eup %2668 }
 0x9a7   : > { %v1657_v11 = vadd.f32 1.0, %v2669_v9 }
 0x9a8   : > { %2670 = vrcp.f32 %v1656_v6 }
 0x9a9   : > { %2672 = vrcp.f32 %v1657_v11 }
 0x9b2   : > { %v2671_v13 = vpop.eup %2670 }
 0x9b3   : > { %v1662_v50 = vmul.f32 %v2671_v13, %v1643_v5  ;;  %v2673_v55 = vpop.eup %2672 }
 0x9b4   : > { %v1665_v56 = vsub.f32 1.0, %v2673_v55  ;;  %v1667_v59 = vmul.f32 %v2673_v55, %v3707_v29 }
 0x9b5   : > { %v1663_v52 = vadd.f32 %v2145_v48, %v1662_v50 }
 0x9b7   : > { %2674 = vtanh.f32 %v1663_v52 }
 0x9c1   : > { %v2675_v57 = vpop.eup %2674 }
 0x9c2   : > { %v1666_v58 = vmul.f32 %v2675_v57, %v1665_v56 }
 0x9c4   : > { %v1668_v61 = vadd.f32 %v1667_v59, %v1666_v58 }
 0x9c6   : > { %v1669_v62 = vmul.f32 %v2146_v60, %v1668_v61  ;;  %v1672_v63 = vsub.f32 %v1668_v61, %v3707_v29 }
 0x9c8   : > { %2149 = vst.msk [vmem:[%s3212_s14 + $0x40] sm:$0xff] %vm741_vm1, %v1669_v62  ;;  %v1673_v0 = vmul.f32 %v2146_v60, %v1672_v63 }
 0x9c9   : > { %2150 = vst.msk [vmem:[%s3212_s14 + $0x8] sm:$0xff] %vm744_vm2, %v1669_v62 }
 0x9ca   : > { %v3759_v1 = vadd.f32 %v1673_v0, %v3707_v29 }
 0x9cc   : > { %v1681_v41 = vpack.c.bf16 %v3759_v1, %v3759_v1 }
 0x9ce   : > { %1715 = vmatmul.mubr.bf16.vlgmr.msra.gmra.mrb[36].mxu0 %v1681_v41  ;;  %2468 = vmatmul.mubr.bf16.vlgmr.msra.gmra.mrb[36].mxu1 %v1681_v41 }
 0x9cf   : > { %2487 = vmatprep.mubr.msk.bf16.mxu0 %vm2810_vm0, %v2808_v42  ;;  %2472 = vmatpush3.bf16.msra.mxu0 %v2578_v47 }
 0x9d0   : > { %2473 = vmatprep.subr.bf16.mxu0 %v2808_v42 }
 0x9d3   : > { %2474 = vmatpush3.bf16.msra.mxu0 %v2579_v44 }
 0x9d4   : > { %2475 = vmatprep.subr.bf16.mxu0 %v2808_v42 }
 0x9d7   : > { %2476 = vmatpush3.bf16.msra.mxu0 %v2580_v45 }
 0x9d8   : > { %2477 = vmatprep.subr.bf16.mxu0 %v2808_v42 }
 0x9db   : > { %2478 = vmatpush3.bf16.msra.mxu0 %v2581_v46 }
 0x9dc   : > { %2479 = vmatprep.subr.bf16.mxu0 %v2808_v42 }
 0x9df   : > { %2480 = vmatpush3.bf16.msra.mxu0 %v2582_v12 }
 0x9e0   : > { %2481 = vmatprep.subr.bf16.mxu0 %v2808_v42 }
 0x9e3   : > { %2482 = vmatpush3.bf16.msra.mxu0 %v2583_v16 }
 0x9e4   : > { %2483 = vmatprep.subr.bf16.mxu0 %v2808_v42 }
 0x9e7   : > { %2484 = vmatpush3.bf16.msra.mxu0 %v2584_v17 }
 0x9e8   : > { %2485 = vmatprep.subr.bf16.mxu0 %v2808_v42 }
 0x9eb   : > { %2486 = vmatpush3.bf16.msra.mxu0 %v2585_v18 }
 0xaa1   : > { %v1716_v20 = vpop.f32.mrb[36].mxu0  ;;  %v1757_v21 = vpop.f32.mrb[36].mxu1 }
 0xaa2   : > { %v1717_v22 = vadd.f32 %v1716_v20, %v3190_v7  ;;  %v1718_v23 = vpop.f32.mrb[37].mxu0  ;;  %v2469_v24 = vpop.f32.mrb[37].mxu1 }
 0xaa3   : > { %v1719_v40 = vadd.f32 %v1718_v23, %v3192_v8  ;;  %v1720_v25 = vpop.f32.mrb[38].mxu0  ;;  %v1760_v26 = vpop.f32.mrb[38].mxu1  ;;  %v1758_v8 = vadd.f32 %v1757_v21, %v3200_v28 }
 0xaa4   : > { %v1763_v27 = vadd.f32 %v2151_v19, %v1717_v22  ;;  %v1721_v51 = vpop.f32.mrb[39].mxu0  ;;  %v2470_v53 = vpop.f32.mrb[39].mxu1 }
 0xaa5   : > { %v1764_v54 = vadd.f32 %v2152_v30, %v1719_v40 }
 0xaa6   : > { %v2155_v29 = vmul.f32 -1.442695, %v1763_v27 }
 0xaa7   : > { %v2156_v42 = vmul.f32 -1.442695, %v1764_v54 }
 0xaa8   : > { %2676 = vpow2.f32 %v2155_v29 }
 0xaa9   : > { %2678 = vpow2.f32 %v2156_v42 }
 0xab2   : > { %v2677_v43 = vpop.eup %2676 }
 0xab3   : > { %v1771_v10 = vadd.f32 1.0, %v2677_v43  ;;  %v2679_v7 = vpop.eup %2678 }
 0xab4   : > { %v1772_v15 = vadd.f32 1.0, %v2679_v7 }
 0xab5   : > { %2680 = vrcp.f32 %v1771_v10 }
 0xab6   : > { %2682 = vrcp.f32 %v1772_v15 }
 0xabf   : > { %v2681_v14 = vpop.eup %2680 }
 0xac0   : > { %v1777_v31 = vmul.f32 %v2681_v14, %v1758_v8  ;;  %v2683_v33 = vpop.eup %2682 }
 0xac1   : > { %v1780_v34 = vsub.f32 1.0, %v2683_v33  ;;  %v1782_v37 = vmul.f32 %v2683_v33, %v3759_v1 }
 0xac2   : > { %v1778_v32 = vadd.f32 %v2153_v49, %v1777_v31 }
 0xac4   : > { %2684 = vtanh.f32 %v1778_v32 }
 0xace   : > { %v2685_v35 = vpop.eup %2684 }
 0xacf   : > { %v1781_v36 = vmul.f32 %v2685_v35, %v1780_v34 }
 0xad1   : > { %v1783_v39 = vadd.f32 %v1782_v37, %v1781_v36 }
 0xad3   : > { %v1784_v28 = vmul.f32 %v2154_v38, %v1783_v39  ;;  %v1787_v2 = vsub.f32 %v1783_v39, %v3759_v1 }
 0xad5   : > { %2157 = vst.msk [vmem:[%s3212_s14 + $0x48] sm:$0xff] %vm741_vm1, %v1784_v28  ;;  %v1788_v3 = vmul.f32 %v2154_v38, %v1787_v2 }
 0xad6   : > { %1786 = vst.msk [vmem:[%s3212_s14] sm:$0xff] %vm744_vm2, %v1784_v28  ;;  %s2718_s14 = scalar_lea.vmem %s2717_s8, 2560 }
 0xad7   : > { %v1789_v4 = vadd.f32 %v1788_v3, %v3759_v1  ;;  %p2720_p3 = scmp.lt.s32.totalorder %s2718_s14, %s2712_s23 }
 0xad9   : > { %v1790_v6 = vpack.c.bf16 %v1789_v4, %v1789_v4  ;;  %p2721_p4 = por %p2720_p3, %p2719_p2 }
 0xadb   : > { %2488 = vmatmul.mubr.bf16.vlgmr.msra.gmra.mrb[40].mxu0 %v1790_v6  ;;  %p2722_p5 = pnand %p2721_p4, %p2715_p1 }
 0xadd   : > { %2725 = shalt.err (!%p2722_p5)
}
 0xade   : > { %s2726_s11 = scalar_lea.hbm %s3819_s21, 1280  ;;  %s2730_s17 = scalar_lea.hbm %s3906_s6, 2560 }
 0xadf   : > { %p2727_p7 = scmp.ne.s32.totalorder %s3819_s21, %s2726_s11  ;;  %p2731_p12 = scmp.lt.u32.totalorder %s3819_s21, %s3906_s6 }
 0xae0   : > { %p2732_p13 = scmp.lt.u32.totalorder %s2730_s17, %s2726_s11  ;;  %p2734_p1 = scmp.lt.u32.totalorder %s2726_s11, %s3819_s21 }
 0xae1   : > { %p2728_p10 = pnand %p2727_p7, %p2898_p6 }
 0xae2   : > { %p2733_p0 = por %p2732_p13, %p2731_p12 }
 0xae3   : > { %p2729_p11 = pneg %p2728_p10 }
 0xae4   : > { %p2735_p2 = por %p2734_p1, %p2733_p0 }
 0xae6   : > { %p2736_p3 = pnand %p2735_p2, %p2729_p11 }
 0xae8   : > { %2739 = shalt.err (!%p2736_p3)
}
 0xae9   : > { %s2812_s23 = smov 128   ;;  %s2813_s28 = smov 256   ;;  %v2158_v9 = vld [vmem:[%s3905_s5] ss:$0 sm:$0xff] }
 0xaea   : > { %s2814_s8 = smov 8   ;;  %s2059_s11 = sshll.u32 %s3184_s20, 3 }
 0xaeb   : > { %2496 = dma.vmem_to_hbm [thread:$0]  (%p2898_p6), %s3821_s18, 1280, %s3819_s21, %s1905_s22, %s2812_s23, %s2813_s28, %s2814_s8  }
 0xaec   : > { %s455_s16 = scalar_lea.vmem [#allocation6], %s2059_s11  ;;  %s3855_s0 = scalar_lea.hbm %s3907_s7, %s3812_s29 }
 0xaed   : > { %s1938_s17 = sshll.u32 %s455_s16, 4  ;;  %s1910_s18 = scalar_lea.sflag [#allocation7], %s3184_s20  ;;  %s3857_s17 = int_to_ptr.vmem [resolvable:$true] %s1938_s17 }
 0xaee   : > { %s2740_s21 = scalar_lea.vmem %s3857_s17, 128  ;;  %s2815_s22 = smov [#allocation6]  }
 0xaef   : > { %p2741_p4 = scmp.ne.s32.totalorder %s3857_s17, %s2740_s21  ;;  %s2744_s23 = sshll.u32 %s2815_s22, 4  ;;  %s2745_s23 = int_to_ptr.vmem [resolvable:$false] %s2744_s23 }
 0xaf0   : > { %s2746_s28 = scalar_lea.vmem %s2745_s23, 256  ;;  %p2747_p10 = scmp.lt.s32.totalorder %s3857_s17, %s2745_s23 }
 0xaf1   : > { %p2742_p5 = pnand %p2741_p4, %p2898_p6  ;;  %p2748_p11 = scmp.lt.s32.totalorder %s2746_s28, %s2740_s21 }
 0xaf3   : > { %p2743_p7 = pneg %p2742_p5  ;;  %p2749_p12 = por %p2748_p11, %p2747_p10 }
 0xaf5   : > { %p2750_p13 = pnand %p2749_p12, %p2743_p7 }
 0xbae   : > { %v1896_v11 = vpop.f32.mrb[40].mxu0 }
 0xbaf   : > { %v1897_v5 = vadd.f32 %v2158_v9, %v1896_v11  ;;  %v2489_v13 = vpop.f32.mrb[41].mxu0 }
 0xbb0   : > { %v1899_v48 = vpop.f32.mrb[42].mxu0 }
 0xbb1   : > { %2686 = vtanh.f32 %v1897_v5  ;;  %v2490_v50 = vpop.f32.mrb[43].mxu0 }
 0xbbb   : > { %v2687_v52 = vpop.eup %2686 }
 0xbbc   : > { %1903 = vst.msk [vmem:[%s455_s16] sm:$0xff] %vm741_vm1, %v2687_v52 }
 0xbbd   : > { %2753 = shalt.err (!%p2750_p13)
}
 0xbbe   : > { %s2754_s20 = scalar_lea.hbm %s3855_s0, 128  ;;  %s2758_s14 = scalar_lea.hbm %s3907_s7, 256 }
 0xbbf   : > { %p2755_p0 = scmp.ne.s32.totalorder %s3855_s0, %s2754_s20  ;;  %p2759_p3 = scmp.lt.u32.totalorder %s3855_s0, %s3907_s7 }
 0xbc0   : > { %p2760_p4 = scmp.lt.u32.totalorder %s2758_s14, %s2754_s20  ;;  %p2762_p7 = scmp.lt.u32.totalorder %s2754_s20, %s3855_s0 }
 0xbc1   : > { %p2756_p1 = pnand %p2755_p0, %p2898_p6 }
 0xbc2   : > { %p2761_p5 = por %p2760_p4, %p2759_p3 }
 0xbc3   : > { %p2757_p2 = pneg %p2756_p1 }
 0xbc4   : > { %p2763_p10 = por %p2762_p7, %p2761_p5 }
 0xbc6   : > { %p2764_p11 = pnand %p2763_p10, %p2757_p2 }
 0xbc8   : > { %2767 = shalt.err (!%p2764_p11)
}
 0xbc9   : > { %2497 = dma.vmem_to_hbm [thread:$0]  (%p2898_p6), %s3857_s17, 128, %s3855_s0, %s1910_s18  }
 0xbca PF: > { %s1950_s16 = sand.u32 1, %s2794_s24   ;;  %p2501_p12 = pnand %p2055_p9, %p2902_p8 }
 0xbcb   : > { %s1951_s9 = scalar_lea.sflag [#allocation5], %s1950_s16 }
 0xbcc   : > { %2785 = dma.done.wait (!%p2501_p12), %s1951_s9, 1280  }
 0xbcd   : > { %2787 = vsyncadd (!%p2501_p12), %s1951_s9, 4294966016  ;;  %s1960_s19 = scalar_lea.sflag [#allocation7], %s1950_s16 }
 0xbce   : > { %2789 = dma.done.wait (!%p2501_p12), %s1960_s19, 128  }
 0xbcf   : > { %2791 = vsyncadd (!%p2501_p12), %s1960_s19, 4294967168  ;;  %p21_p6 = scmp.ge.s32.totalorder %s2879_s30, 4   ;;  %s3913_s24 = smov %s2798_s25 }
 0xbd0   : > { %s3914_s25 = smov %s2802_s26  ;;  %s3915_s26 = smov %s2892_s10 }
 0xbd1   : > { %s3916_s27 = smov %s2879_s30  ;;  %23 = sbr.rel (!%p21_p6) target bundleno = 7 (0x7), region = 197 }
 0xbd8   :  { %1965 = vsyncpa [#allocation5], 1 }
 0xbd9   :  { %1967 = vsyncpa [#allocation5 + $0x1], 1 }
 0xbda   :  { %1968 = vsyncpa [#allocation7], 1 }
 0xbdb   :  { %1970 = vsyncpa [#allocation7 + $0x1], 1 }

</bundles_post_ra>
